<compile_context>
chip_gen: v5e
topology: v5e:2x2
jax: 0.10.0
libtpu: 0.0.40
codegen_flags: <defaults>
</compile_context>

<pallas_src>
import functools

import jax
import jax.numpy as jnp
from jax import lax
from jax.experimental import pallas as pl
from jax.experimental.pallas import tpu as pltpu

KERNEL_SIZE = 3
INPUT_SIZE = 1
NUM_CHANNELS = [16, 32, 64]
OUTPUT_SIZE = 1


# ----------------------------------------------------------------------------
# Fused Pallas kernel: whole TCN for one tile of B_TILE batch elements.
# Column layout everywhere: col = t * B_TILE + b  (time outer, batch inner),
# so a dilated time-shift is a contiguous column shift of dil*B_TILE and the
# per-time-step halo zeros never leak across batch entries.
# ----------------------------------------------------------------------------
def fused_tcn_kernel(x_ref, w_ref, o_ref, pad_buf, col_buf, *,
                     L, K, B_TILE, padmax, chans, dils, offs, lin_off, out_dim):
    f32 = jnp.float32
    LB = L * B_TILE                       # lane width of every activation
    pB = padmax * B_TILE                  # halo width (columns) on each side
    cmax = pad_buf.shape[0]

    # Zero only the halo columns; the interior is overwritten by every conv.
    pad_buf[:, 0:pB] = jnp.zeros((cmax, pB), f32)
    pad_buf[:, pB + LB:pB + LB + pB] = jnp.zeros((cmax, pB), f32)

    def im2col(cin, dil):
        """Stack K shifted windows of pad_buf rows [0:cin] + a ones bias row."""
        for k in range(K):                                    # static unroll
            s = (padmax + (k - (K - 1) // 2) * dil) * B_TILE  # halo gives zeros
            col_buf[k * cin:(k + 1) * cin, :] = pad_buf[0:cin, s:s + LB]
        col_buf[K * cin:K * cin + 1, :] = jnp.ones((1, LB), f32)

    cur = x_ref[0]                                            # (cin0_pad, LB)
    for i in range(len(dils)):                                # static unroll
        cin, cout, dil = chans[i], chans[i + 1], dils[i]
        offA, offB = offs[i]

        # ---- conv1 + 1x1 downsample residual: ONE matmul (2*cout rows) -----
        pad_buf[0:cin, pB:pB + LB] = cur
        im2col(cin, dil)
        rhs = col_buf[0:K * cin + 1, :]                       # (K*cin+1, LB)
        wA = w_ref[offA:offA + 2 * cout, 0:K * cin + 1]       # static sub-view
        both = jnp.dot(wA, rhs, preferred_element_type=f32)   # (2*cout, LB)
        h1 = jnp.maximum(both[0:cout, :], 0.0)                # relu(conv1)+bias
        res = both[cout:2 * cout, :]                          # downsample+bias

        # ---- conv2 ----------------------------------------------------------
        pad_buf[0:cout, pB:pB + LB] = h1
        im2col(cout, dil)
        rhs2 = col_buf[0:K * cout + 1, :]
        wB = w_ref[offB:offB + cout, 0:K * cout + 1]
        h2 = jnp.maximum(jnp.dot(wB, rhs2, preferred_element_type=f32), 0.0)

        cur = jnp.maximum(h2 + res, 0.0)                      # (cout, LB)

    # ---- final Linear on the last time step, lane-dense (O, B_TILE) store ---
    c_last = chans[-1]
    last = cur[:, (L - 1) * B_TILE:LB]                        # (c_last, B_TILE)
    wl = w_ref[lin_off:lin_off + out_dim, 0:c_last]           # (O, c_last)
    bl = w_ref[lin_off:lin_off + out_dim, c_last:c_last + 1]  # (O, 1)
    out = jnp.dot(wl, last, preferred_element_type=f32) + bl  # (O, B_TILE)
    o_ref[0] = out


# ----------------------------------------------------------------------------
# Host-side weight packing: one (rows, w_cols) f32 buffer, 8-row-aligned
# pieces, biases folded as the last weight column.
# ----------------------------------------------------------------------------
def _pack_weights(block_params, lin_params, chans, K, w_cols):
    pieces, offs = [], []
    row = 0

    def _add(piece):
        nonlocal row
        r, c = piece.shape
        piece = jnp.pad(piece, ((0, (-r) % 8), (0, w_cols - c)))
        off = row
        row += piece.shape[0]
        pieces.append(piece.astype(jnp.float32))
        return off

    for i, bp in enumerate(block_params):
        cin = chans[i]                       # padded cin (multiple of 8)
        cout = bp["w1"].shape[0]
        cin_orig = bp["w1"].shape[1]

        w1 = bp["w1"]
        if cin_orig < cin:
            w1 = jnp.pad(w1, ((0, 0), (0, cin - cin_orig), (0, 0)))
        # column order must match col_buf rows: k*cin + c
        w1f = jnp.transpose(w1, (0, 2, 1)).reshape(cout, K * cin)
        a_top = jnp.concatenate([w1f, bp["b1"].reshape(cout, 1)], axis=1)

        wd = bp["wd"]
        if cin_orig < cin:
            wd = jnp.pad(wd, ((0, 0), (0, cin - cin_orig)))
        a_bot = jnp.zeros((cout, K * cin + 1), jnp.float32)
        a_bot = a_bot.at[:, cin:2 * cin].set(wd)              # k=1 = zero shift
        a_bot = a_bot.at[:, K * cin].set(bp["bd"].reshape(cout))
        offA = _add(jnp.concatenate([a_top, a_bot], axis=0))  # (2*cout, K*cin+1)

        w2f = jnp.transpose(bp["w2"], (0, 2, 1)).reshape(cout, K * cout)
        offB = _add(jnp.concatenate([w2f, bp["b2"].reshape(cout, 1)], axis=1))
        offs.append((offA, offB))

    O = lin_params["w"].shape[0]
    lin_off = _add(jnp.concatenate([lin_params["w"],
                                    lin_params["b"].reshape(O, 1)], axis=1))
    return jnp.concatenate(pieces, axis=0), tuple(offs), lin_off


# ----------------------------------------------------------------------------
# Wrapper: batch tiling + single pallas_call
# ----------------------------------------------------------------------------
def tcn_forward(x, block_params, lin_params, *, b_tile=None):
    B, cin0, L = x.shape
    n_blocks = len(block_params)
    K = KERNEL_SIZE
    dils = tuple(2 ** i for i in range(n_blocks))
    padmax = (K - 1) * dils[-1] // 2
    cin0_pad = ((cin0 + 7) // 8) * 8
    chans = (cin0_pad,) + tuple(bp["w1"].shape[0] for bp in block_params)
    cmax = max(chans)
    O = lin_params["w"].shape[0]

    if b_tile is None:
        b_tile = max(1, -(-128 // L))       # fill >= 128 lanes per tile
    Bp = ((B + b_tile - 1) // b_tile) * b_tile
    G = Bp // b_tile
    LB = L * b_tile

    # Input layout (host): (G, cin0_pad, L*b_tile), column = t*b_tile + b.
    xp = jnp.pad(x, ((0, Bp - B), (0, cin0_pad - cin0), (0, 0)))
    xt = xp.reshape(G, b_tile, cin0_pad, L).transpose(0, 2, 3, 1) \
           .reshape(G, cin0_pad, LB)

    w_cols = ((K * cmax + 1 + 127) // 128) * 128
    w_pack, offs, lin_off = _pack_weights(block_params, lin_params, chans, K,
                                          w_cols)

    kernel = functools.partial(
        fused_tcn_kernel, L=L, K=K, B_TILE=b_tile, padmax=padmax,
        chans=chans, dils=dils, offs=offs, lin_off=lin_off, out_dim=O)

    out = pl.pallas_call(
        kernel,
        out_shape=jax.ShapeDtypeStruct((G, O, b_tile), jnp.float32),
        grid=(G,),
        in_specs=[
            pl.BlockSpec((1, cin0_pad, LB), lambda g: (g, 0, 0)),
            pl.BlockSpec(w_pack.shape, lambda g: (0, 0)),   # constant -> 1 DMA
        ],
        out_specs=pl.BlockSpec((1, O, b_tile), lambda g: (g, 0, 0)),
        scratch_shapes=[
            pltpu.VMEM((cmax, (L + 2 * padmax) * b_tile), jnp.float32),  # halo
            pltpu.VMEM((((K * cmax + 1 + 7) // 8) * 8, LB), jnp.float32),  # im2col
        ],
        compiler_params=pltpu.CompilerParams(
            dimension_semantics=("parallel",)),
    )(xt, w_pack)

    # (G, O, b_tile) -> (Bp, O) -> (B, O)
    return out.transpose(0, 2, 1).reshape(Bp, O)[:B]


# ----------------------------------------------------------------------------
# Deterministic parameter init (PyTorch-style uniform fan-in bounds)
# ----------------------------------------------------------------------------
def init_params(key):
    block_params = []
    chans = [INPUT_SIZE] + NUM_CHANNELS
    for i in range(len(NUM_CHANNELS)):
        cin, cout = chans[i], chans[i + 1]
        key, *ks = jax.random.split(key, 7)
        bnd1 = 1.0 / (cin * KERNEL_SIZE) ** 0.5
        bnd2 = 1.0 / (cout * KERNEL_SIZE) ** 0.5
        bndd = 1.0 / cin ** 0.5
        block_params.append(dict(
            w1=jax.random.uniform(ks[0], (cout, cin, KERNEL_SIZE),
                                  jnp.float32, -bnd1, bnd1),
            b1=jax.random.uniform(ks[1], (cout, 1), jnp.float32, -bnd1, bnd1),
            w2=jax.random.uniform(ks[2], (cout, cout, KERNEL_SIZE),
                                  jnp.float32, -bnd2, bnd2),
            b2=jax.random.uniform(ks[3], (cout, 1), jnp.float32, -bnd2, bnd2),
            wd=jax.random.uniform(ks[4], (cout, cin), jnp.float32, -bndd, bndd),
            bd=jax.random.uniform(ks[5], (cout, 1), jnp.float32, -bndd, bndd),
        ))
    key, k1, k2 = jax.random.split(key, 3)
    bndl = 1.0 / NUM_CHANNELS[-1] ** 0.5
    lin_params = dict(
        w=jax.random.uniform(k1, (OUTPUT_SIZE, NUM_CHANNELS[-1]),
                             jnp.float32, -bndl, bndl),
        b=jax.random.uniform(k2, (OUTPUT_SIZE,), jnp.float32, -bndl, bndl),
    )
    return block_params, lin_params


# ----------------------------------------------------------------------------
# Pure-JAX reference (matches the PyTorch module: symmetric 'same' padding,
# unconditional 1x1 downsample since Cin != Cout for every block, dropout
# identity at inference).
# ----------------------------------------------------------------------------
def _conv1d_ref(x, w, b, dil, pad):
    y = lax.conv_general_dilated(x, w, window_strides=(1,),
                                 padding=[(pad, pad)], rhs_dilation=(dil,),
                                 dimension_numbers=("NCH", "OIH", "NCH"))
    return y + b.reshape(1, -1, 1)


def tcn_ref(x, block_params, lin_params):
    out = x
    for i, blk in enumerate(block_params):
        dil = 2 ** i
        pad = (KERNEL_SIZE - 1) * dil // 2
        h = jax.nn.relu(_conv1d_ref(out, blk["w1"], blk["b1"][:, 0], dil, pad))
        h2 = jax.nn.relu(_conv1d_ref(h, blk["w2"], blk["b2"][:, 0], dil, pad))
        res = _conv1d_ref(out, blk["wd"][:, :, None], blk["bd"][:, 0], 1, 0)
        out = jax.nn.relu(h2 + res)
    last = out[:, :, -1]
    return last @ lin_params["w"].T + lin_params["b"]


# ----------------------------------------------------------------------------
if __name__ == "__main__":
    key = jax.random.PRNGKey(0)
    key_x, key_p = jax.random.split(key)
    block_params, lin_params = init_params(key_p)

    # B=16, L=16 -> B_TILE=8 (128-lane tiles), grid of 2 (both v7x TCs busy).
    B, L = 16, 16
    x = jax.random.normal(key_x, (B, INPUT_SIZE, L), jnp.float32)
    out = jax.block_until_ready(tcn_forward(x, block_params, lin_params))
    ref = tcn_ref(x, block_params, lin_params)
    assert out.shape == (B, OUTPUT_SIZE), out.shape
    assert jnp.allclose(out, ref, atol=1e-4, rtol=1e-4), (out, ref)

    # Ragged batch (exercises the batch-padding path).
    x2 = jax.random.normal(key_x, (3, INPUT_SIZE, L), jnp.float32)
    out2 = jax.block_until_ready(tcn_forward(x2, block_params, lin_params))
    ref2 = tcn_ref(x2, block_params, lin_params)
    assert jnp.allclose(out2, ref2, atol=1e-4, rtol=1e-4), (out2, ref2)

    print("KERNEL_OK")
</pallas_src>

<mosaic_0001>
module attributes {stable_mosaic.version = 11 : i64} {
  func.func @fused_tcn_kernel(%arg0: i32, %arg1: memref<1x8x128xf32, #tpu.memory_space<vmem>>, %arg2: memref<344x256xf32, #tpu.memory_space<vmem>>, %arg3: memref<1x1x8xf32, #tpu.memory_space<vmem>>, %arg4: memref<64x192xf32, #tpu.memory_space<vmem>>, %arg5: memref<200x128xf32, #tpu.memory_space<vmem>>) attributes {dimension_semantics = [#tpu.dimension_semantics<parallel>], iteration_bounds = array<i64: 2>, scalar_prefetch = 0 : i64, scratch_operands = 2 : i64, tpu.core_type = #tpu.core_type<tc>, window_params = [{transform_indices = @transform_0, window_bounds = array<i64: 1, 8, 128>}, {pipeline_mode = #tpu.pipeline_mode<synchronous>, transform_indices = @transform_1, window_bounds = array<i64: 344, 256>}, {transform_indices = @transform_2, window_bounds = array<i64: 1, 1, 8>}]} {
    %cst = arith.constant 0.000000e+00 : f32
    %0 = vector.broadcast %cst : f32 to vector<64x32xf32>
    %c0 = arith.constant 0 : index
    %c0_0 = arith.constant 0 : index
    %1 = vector.load %arg4[%c0, %c0_0] : memref<64x192xf32, #tpu.memory_space<vmem>>, vector<64x32xf32>
    tpu.vector_store %arg4[%c0, %c0_0], %0 {strides = array<i32>} : memref<64x192xf32, #tpu.memory_space<vmem>>, vector<64x32xf32>,
    %cst_1 = arith.constant 0.000000e+00 : f32
    %2 = vector.broadcast %cst_1 : f32 to vector<64x32xf32>
    %c0_2 = arith.constant 0 : index
    %c160 = arith.constant 160 : index
    %3 = vector.load %arg4[%c0_2, %c160] : memref<64x192xf32, #tpu.memory_space<vmem>>, vector<64x32xf32>
    tpu.vector_store %arg4[%c0_2, %c160], %2 {strides = array<i32>} : memref<64x192xf32, #tpu.memory_space<vmem>>, vector<64x32xf32>,
    %c0_3 = arith.constant 0 : index
    %c0_4 = arith.constant 0 : index
    %c0_5 = arith.constant 0 : index
    %4 = vector.load %arg1[%c0_3, %c0_4, %c0_5] : memref<1x8x128xf32, #tpu.memory_space<vmem>>, vector<1x8x128xf32>
    %5 = vector.shape_cast %4 : vector<1x8x128xf32> to vector<8x128xf32>
    %c0_6 = arith.constant 0 : index
    %c32 = arith.constant 32 : index
    %6 = vector.load %arg4[%c0_6, %c32] : memref<64x192xf32, #tpu.memory_space<vmem>>, vector<8x128xf32>
    tpu.vector_store %arg4[%c0_6, %c32], %5 {strides = array<i32>} : memref<64x192xf32, #tpu.memory_space<vmem>>, vector<8x128xf32>,
    %c0_7 = arith.constant 0 : index
    %c24 = arith.constant 24 : index
    %7 = vector.load %arg4[%c0_7, %c24] : memref<64x192xf32, #tpu.memory_space<vmem>>, vector<8x128xf32>
    %c0_8 = arith.constant 0 : index
    %c0_9 = arith.constant 0 : index
    %8 = vector.load %arg5[%c0_8, %c0_9] : memref<200x128xf32, #tpu.memory_space<vmem>>, vector<8x128xf32>
    tpu.vector_store %arg5[%c0_8, %c0_9], %7 {strides = array<i32>} : memref<200x128xf32, #tpu.memory_space<vmem>>, vector<8x128xf32>,
    %c0_10 = arith.constant 0 : index
    %c32_11 = arith.constant 32 : index
    %9 = vector.load %arg4[%c0_10, %c32_11] : memref<64x192xf32, #tpu.memory_space<vmem>>, vector<8x128xf32>
    %c8 = arith.constant 8 : index
    %c0_12 = arith.constant 0 : index
    %10 = vector.load %arg5[%c8, %c0_12] : memref<200x128xf32, #tpu.memory_space<vmem>>, vector<8x128xf32>
    tpu.vector_store %arg5[%c8, %c0_12], %9 {strides = array<i32>} : memref<200x128xf32, #tpu.memory_space<vmem>>, vector<8x128xf32>,
    %c0_13 = arith.constant 0 : index
    %c40 = arith.constant 40 : index
    %11 = vector.load %arg4[%c0_13, %c40] : memref<64x192xf32, #tpu.memory_space<vmem>>, vector<8x128xf32>
    %c16 = arith.constant 16 : index
    %c0_14 = arith.constant 0 : index
    %12 = vector.load %arg5[%c16, %c0_14] : memref<200x128xf32, #tpu.memory_space<vmem>>, vector<8x128xf32>
    tpu.vector_store %arg5[%c16, %c0_14], %11 {strides = array<i32>} : memref<200x128xf32, #tpu.memory_space<vmem>>, vector<8x128xf32>,
    %cst_15 = arith.constant 1.000000e+00 : f32
    %13 = vector.broadcast %cst_15 : f32 to vector<1x128xf32>
    %c24_16 = arith.constant 24 : index
    %c0_17 = arith.constant 0 : index
    %14 = vector.load %arg5[%c24_16, %c0_17] : memref<200x128xf32, #tpu.memory_space<vmem>>, vector<1x128xf32>
    tpu.vector_store %arg5[%c24_16, %c0_17], %13 {strides = array<i32>} : memref<200x128xf32, #tpu.memory_space<vmem>>, vector<1x128xf32>,
    %c0_18 = arith.constant 0 : index
    %c0_19 = arith.constant 0 : index
    %15 = vector.load %arg5[%c0_18, %c0_19] : memref<200x128xf32, #tpu.memory_space<vmem>>, vector<25x128xf32>
    %c0_20 = arith.constant 0 : index
    %c0_21 = arith.constant 0 : index
    %16 = vector.load %arg2[%c0_20, %c0_21] : memref<344x256xf32, #tpu.memory_space<vmem>>, vector<32x25xf32>
    %cst_22 = arith.constant dense<0.000000e+00> : vector<32x128xf32>
    %17 = tpu.matmul %16, %15, %cst_22 {dimension_numbers = #tpu.dot_dimension_numbers<[1], [0], [0], [1], [0, 0, 1, 1], [], []>} : vector<32x25xf32>, vector<25x128xf32>, vector<32x128xf32> -> vector<32x128xf32>
    %18 = vector.extract_strided_slice %17 {offsets = [0, 0], sizes = [16, 128], strides = [1, 1]} : vector<32x128xf32> to vector<16x128xf32>
    %cst_23 = arith.constant 0.000000e+00 : f32
    %19 = vector.broadcast %cst_23 : f32 to vector<16x128xf32>
    %20 = arith.maximumf %18, %19 : vector<16x128xf32>
    %21 = vector.extract_strided_slice %17 {offsets = [16, 0], sizes = [16, 128], strides = [1, 1]} : vector<32x128xf32> to vector<16x128xf32>
    %c0_24 = arith.constant 0 : index
    %c32_25 = arith.constant 32 : index
    %22 = vector.load %arg4[%c0_24, %c32_25] : memref<64x192xf32, #tpu.memory_space<vmem>>, vector<16x128xf32>
    tpu.vector_store %arg4[%c0_24, %c32_25], %20 {strides = array<i32>} : memref<64x192xf32, #tpu.memory_space<vmem>>, vector<16x128xf32>,
    %c0_26 = arith.constant 0 : index
    %c24_27 = arith.constant 24 : index
    %23 = vector.load %arg4[%c0_26, %c24_27] : memref<64x192xf32, #tpu.memory_space<vmem>>, vector<16x128xf32>
    %c0_28 = arith.constant 0 : index
    %c0_29 = arith.constant 0 : index
    %24 = vector.load %arg5[%c0_28, %c0_29] : memref<200x128xf32, #tpu.memory_space<vmem>>, vector<16x128xf32>
    tpu.vector_store %arg5[%c0_28, %c0_29], %23 {strides = array<i32>} : memref<200x128xf32, #tpu.memory_space<vmem>>, vector<16x128xf32>,
    %c0_30 = arith.constant 0 : index
    %c32_31 = arith.constant 32 : index
    %25 = vector.load %arg4[%c0_30, %c32_31] : memref<64x192xf32, #tpu.memory_space<vmem>>, vector<16x128xf32>
    %c16_32 = arith.constant 16 : index
    %c0_33 = arith.constant 0 : index
    %26 = vector.load %arg5[%c16_32, %c0_33] : memref<200x128xf32, #tpu.memory_space<vmem>>, vector<16x128xf32>
    tpu.vector_store %arg5[%c16_32, %c0_33], %25 {strides = array<i32>} : memref<200x128xf32, #tpu.memory_space<vmem>>, vector<16x128xf32>,
    %c0_34 = arith.constant 0 : index
    %c40_35 = arith.constant 40 : index
    %27 = vector.load %arg4[%c0_34, %c40_35] : memref<64x192xf32, #tpu.memory_space<vmem>>, vector<16x128xf32>
    %c32_36 = arith.constant 32 : index
    %c0_37 = arith.constant 0 : index
    %28 = vector.load %arg5[%c32_36, %c0_37] : memref<200x128xf32, #tpu.memory_space<vmem>>, vector<16x128xf32>
    tpu.vector_store %arg5[%c32_36, %c0_37], %27 {strides = array<i32>} : memref<200x128xf32, #tpu.memory_space<vmem>>, vector<16x128xf32>,
    %cst_38 = arith.constant 1.000000e+00 : f32
    %29 = vector.broadcast %cst_38 : f32 to vector<1x128xf32>
    %c48 = arith.constant 48 : index
    %c0_39 = arith.constant 0 : index
    %30 = vector.load %arg5[%c48, %c0_39] : memref<200x128xf32, #tpu.memory_space<vmem>>, vector<1x128xf32>
    tpu.vector_store %arg5[%c48, %c0_39], %29 {strides = array<i32>} : memref<200x128xf32, #tpu.memory_space<vmem>>, vector<1x128xf32>,
    %c0_40 = arith.constant 0 : index
    %c0_41 = arith.constant 0 : index
    %31 = vector.load %arg5[%c0_40, %c0_41] : memref<200x128xf32, #tpu.memory_space<vmem>>, vector<49x128xf32>
    %c32_42 = arith.constant 32 : index
    %c0_43 = arith.constant 0 : index
    %32 = vector.load %arg2[%c32_42, %c0_43] : memref<344x256xf32, #tpu.memory_space<vmem>>, vector<16x49xf32>
    %cst_44 = arith.constant dense<0.000000e+00> : vector<16x128xf32>
    %33 = tpu.matmul %32, %31, %cst_44 {dimension_numbers = #tpu.dot_dimension_numbers<[1], [0], [0], [1], [0, 0, 1, 1], [], []>} : vector<16x49xf32>, vector<49x128xf32>, vector<16x128xf32> -> vector<16x128xf32>
    %cst_45 = arith.constant 0.000000e+00 : f32
    %34 = vector.broadcast %cst_45 : f32 to vector<16x128xf32>
    %35 = arith.maximumf %33, %34 : vector<16x128xf32>
    %36 = arith.addf %35, %21 : vector<16x128xf32>
    %cst_46 = arith.constant 0.000000e+00 : f32
    %37 = vector.broadcast %cst_46 : f32 to vector<16x128xf32>
    %38 = arith.maximumf %36, %37 : vector<16x128xf32>
    %c0_47 = arith.constant 0 : index
    %c32_48 = arith.constant 32 : index
    %39 = vector.load %arg4[%c0_47, %c32_48] : memref<64x192xf32, #tpu.memory_space<vmem>>, vector<16x128xf32>
    tpu.vector_store %arg4[%c0_47, %c32_48], %38 {strides = array<i32>} : memref<64x192xf32, #tpu.memory_space<vmem>>, vector<16x128xf32>,
    %c0_49 = arith.constant 0 : index
    %c16_50 = arith.constant 16 : index
    %40 = vector.load %arg4[%c0_49, %c16_50] : memref<64x192xf32, #tpu.memory_space<vmem>>, vector<16x128xf32>
    %c0_51 = arith.constant 0 : index
    %c0_52 = arith.constant 0 : index
    %41 = vector.load %arg5[%c0_51, %c0_52] : memref<200x128xf32, #tpu.memory_space<vmem>>, vector<16x128xf32>
    tpu.vector_store %arg5[%c0_51, %c0_52], %40 {strides = array<i32>} : memref<200x128xf32, #tpu.memory_space<vmem>>, vector<16x128xf32>,
    %c0_53 = arith.constant 0 : index
    %c32_54 = arith.constant 32 : index
    %42 = vector.load %arg4[%c0_53, %c32_54] : memref<64x192xf32, #tpu.memory_space<vmem>>, vector<16x128xf32>
    %c16_55 = arith.constant 16 : index
    %c0_56 = arith.constant 0 : index
    %43 = vector.load %arg5[%c16_55, %c0_56] : memref<200x128xf32, #tpu.memory_space<vmem>>, vector<16x128xf32>
    tpu.vector_store %arg5[%c16_55, %c0_56], %42 {strides = array<i32>} : memref<200x128xf32, #tpu.memory_space<vmem>>, vector<16x128xf32>,
    %c0_57 = arith.constant 0 : index
    %c48_58 = arith.constant 48 : index
    %44 = vector.load %arg4[%c0_57, %c48_58] : memref<64x192xf32, #tpu.memory_space<vmem>>, vector<16x128xf32>
    %c32_59 = arith.constant 32 : index
    %c0_60 = arith.constant 0 : index
    %45 = vector.load %arg5[%c32_59, %c0_60] : memref<200x128xf32, #tpu.memory_space<vmem>>, vector<16x128xf32>
    tpu.vector_store %arg5[%c32_59, %c0_60], %44 {strides = array<i32>} : memref<200x128xf32, #tpu.memory_space<vmem>>, vector<16x128xf32>,
    %cst_61 = arith.constant 1.000000e+00 : f32
    %46 = vector.broadcast %cst_61 : f32 to vector<1x128xf32>
    %c48_62 = arith.constant 48 : index
    %c0_63 = arith.constant 0 : index
    %47 = vector.load %arg5[%c48_62, %c0_63] : memref<200x128xf32, #tpu.memory_space<vmem>>, vector<1x128xf32>
    tpu.vector_store %arg5[%c48_62, %c0_63], %46 {strides = array<i32>} : memref<200x128xf32, #tpu.memory_space<vmem>>, vector<1x128xf32>,
    %c0_64 = arith.constant 0 : index
    %c0_65 = arith.constant 0 : index
    %48 = vector.load %arg5[%c0_64, %c0_65] : memref<200x128xf32, #tpu.memory_space<vmem>>, vector<49x128xf32>
    %c48_66 = arith.constant 48 : index
    %c0_67 = arith.constant 0 : index
    %49 = vector.load %arg2[%c48_66, %c0_67] : memref<344x256xf32, #tpu.memory_space<vmem>>, vector<64x49xf32>
    %cst_68 = arith.constant dense<0.000000e+00> : vector<64x128xf32>
    %50 = tpu.matmul %49, %48, %cst_68 {dimension_numbers = #tpu.dot_dimension_numbers<[1], [0], [0], [1], [0, 0, 1, 1], [], []>} : vector<64x49xf32>, vector<49x128xf32>, vector<64x128xf32> -> vector<64x128xf32>
    %51 = vector.extract_strided_slice %50 {offsets = [0, 0], sizes = [32, 128], strides = [1, 1]} : vector<64x128xf32> to vector<32x128xf32>
    %cst_69 = arith.constant 0.000000e+00 : f32
    %52 = vector.broadcast %cst_69 : f32 to vector<32x128xf32>
    %53 = arith.maximumf %51, %52 : vector<32x128xf32>
    %54 = vector.extract_strided_slice %50 {offsets = [32, 0], sizes = [32, 128], strides = [1, 1]} : vector<64x128xf32> to vector<32x128xf32>
    %c0_70 = arith.constant 0 : index
    %c32_71 = arith.constant 32 : index
    %55 = vector.load %arg4[%c0_70, %c32_71] : memref<64x192xf32, #tpu.memory_space<vmem>>, vector<32x128xf32>
    tpu.vector_store %arg4[%c0_70, %c32_71], %53 {strides = array<i32>} : memref<64x192xf32, #tpu.memory_space<vmem>>, vector<32x128xf32>,
    %c0_72 = arith.constant 0 : index
    %c16_73 = arith.constant 16 : index
    %56 = vector.load %arg4[%c0_72, %c16_73] : memref<64x192xf32, #tpu.memory_space<vmem>>, vector<32x128xf32>
    %c0_74 = arith.constant 0 : index
    %c0_75 = arith.constant 0 : index
    %57 = vector.load %arg5[%c0_74, %c0_75] : memref<200x128xf32, #tpu.memory_space<vmem>>, vector<32x128xf32>
    tpu.vector_store %arg5[%c0_74, %c0_75], %56 {strides = array<i32>} : memref<200x128xf32, #tpu.memory_space<vmem>>, vector<32x128xf32>,
    %c0_76 = arith.constant 0 : index
    %c32_77 = arith.constant 32 : index
    %58 = vector.load %arg4[%c0_76, %c32_77] : memref<64x192xf32, #tpu.memory_space<vmem>>, vector<32x128xf32>
    %c32_78 = arith.constant 32 : index
    %c0_79 = arith.constant 0 : index
    %59 = vector.load %arg5[%c32_78, %c0_79] : memref<200x128xf32, #tpu.memory_space<vmem>>, vector<32x128xf32>
    tpu.vector_store %arg5[%c32_78, %c0_79], %58 {strides = array<i32>} : memref<200x128xf32, #tpu.memory_space<vmem>>, vector<32x128xf32>,
    %c0_80 = arith.constant 0 : index
    %c48_81 = arith.constant 48 : index
    %60 = vector.load %arg4[%c0_80, %c48_81] : memref<64x192xf32, #tpu.memory_space<vmem>>, vector<32x128xf32>
    %c64 = arith.constant 64 : index
    %c0_82 = arith.constant 0 : index
    %61 = vector.load %arg5[%c64, %c0_82] : memref<200x128xf32, #tpu.memory_space<vmem>>, vector<32x128xf32>
    tpu.vector_store %arg5[%c64, %c0_82], %60 {strides = array<i32>} : memref<200x128xf32, #tpu.memory_space<vmem>>, vector<32x128xf32>,
    %cst_83 = arith.constant 1.000000e+00 : f32
    %62 = vector.broadcast %cst_83 : f32 to vector<1x128xf32>
    %c96 = arith.constant 96 : index
    %c0_84 = arith.constant 0 : index
    %63 = vector.load %arg5[%c96, %c0_84] : memref<200x128xf32, #tpu.memory_space<vmem>>, vector<1x128xf32>
    tpu.vector_store %arg5[%c96, %c0_84], %62 {strides = array<i32>} : memref<200x128xf32, #tpu.memory_space<vmem>>, vector<1x128xf32>,
    %c0_85 = arith.constant 0 : index
    %c0_86 = arith.constant 0 : index
    %64 = vector.load %arg5[%c0_85, %c0_86] : memref<200x128xf32, #tpu.memory_space<vmem>>, vector<97x128xf32>
    %c112 = arith.constant 112 : index
    %c0_87 = arith.constant 0 : index
    %65 = vector.load %arg2[%c112, %c0_87] : memref<344x256xf32, #tpu.memory_space<vmem>>, vector<32x97xf32>
    %cst_88 = arith.constant dense<0.000000e+00> : vector<32x128xf32>
    %66 = tpu.matmul %65, %64, %cst_88 {dimension_numbers = #tpu.dot_dimension_numbers<[1], [0], [0], [1], [0, 0, 1, 1], [], []>} : vector<32x97xf32>, vector<97x128xf32>, vector<32x128xf32> -> vector<32x128xf32>
    %cst_89 = arith.constant 0.000000e+00 : f32
    %67 = vector.broadcast %cst_89 : f32 to vector<32x128xf32>
    %68 = arith.maximumf %66, %67 : vector<32x128xf32>
    %69 = arith.addf %68, %54 : vector<32x128xf32>
    %cst_90 = arith.constant 0.000000e+00 : f32
    %70 = vector.broadcast %cst_90 : f32 to vector<32x128xf32>
    %71 = arith.maximumf %69, %70 : vector<32x128xf32>
    %c0_91 = arith.constant 0 : index
    %c32_92 = arith.constant 32 : index
    %72 = vector.load %arg4[%c0_91, %c32_92] : memref<64x192xf32, #tpu.memory_space<vmem>>, vector<32x128xf32>
    tpu.vector_store %arg4[%c0_91, %c32_92], %71 {strides = array<i32>} : memref<64x192xf32, #tpu.memory_space<vmem>>, vector<32x128xf32>,
    %c0_93 = arith.constant 0 : index
    %c0_94 = arith.constant 0 : index
    %73 = vector.load %arg4[%c0_93, %c0_94] : memref<64x192xf32, #tpu.memory_space<vmem>>, vector<32x128xf32>
    %c0_95 = arith.constant 0 : index
    %c0_96 = arith.constant 0 : index
    %74 = vector.load %arg5[%c0_95, %c0_96] : memref<200x128xf32, #tpu.memory_space<vmem>>, vector<32x128xf32>
    tpu.vector_store %arg5[%c0_95, %c0_96], %73 {strides = array<i32>} : memref<200x128xf32, #tpu.memory_space<vmem>>, vector<32x128xf32>,
    %c0_97 = arith.constant 0 : index
    %c32_98 = arith.constant 32 : index
    %75 = vector.load %arg4[%c0_97, %c32_98] : memref<64x192xf32, #tpu.memory_space<vmem>>, vector<32x128xf32>
    %c32_99 = arith.constant 32 : index
    %c0_100 = arith.constant 0 : index
    %76 = vector.load %arg5[%c32_99, %c0_100] : memref<200x128xf32, #tpu.memory_space<vmem>>, vector<32x128xf32>
    tpu.vector_store %arg5[%c32_99, %c0_100], %75 {strides = array<i32>} : memref<200x128xf32, #tpu.memory_space<vmem>>, vector<32x128xf32>,
    %c0_101 = arith.constant 0 : index
    %c64_102 = arith.constant 64 : index
    %77 = vector.load %arg4[%c0_101, %c64_102] : memref<64x192xf32, #tpu.memory_space<vmem>>, vector<32x128xf32>
    %c64_103 = arith.constant 64 : index
    %c0_104 = arith.constant 0 : index
    %78 = vector.load %arg5[%c64_103, %c0_104] : memref<200x128xf32, #tpu.memory_space<vmem>>, vector<32x128xf32>
    tpu.vector_store %arg5[%c64_103, %c0_104], %77 {strides = array<i32>} : memref<200x128xf32, #tpu.memory_space<vmem>>, vector<32x128xf32>,
    %cst_105 = arith.constant 1.000000e+00 : f32
    %79 = vector.broadcast %cst_105 : f32 to vector<1x128xf32>
    %c96_106 = arith.constant 96 : index
    %c0_107 = arith.constant 0 : index
    %80 = vector.load %arg5[%c96_106, %c0_107] : memref<200x128xf32, #tpu.memory_space<vmem>>, vector<1x128xf32>
    tpu.vector_store %arg5[%c96_106, %c0_107], %79 {strides = array<i32>} : memref<200x128xf32, #tpu.memory_space<vmem>>, vector<1x128xf32>,
    %c0_108 = arith.constant 0 : index
    %c0_109 = arith.constant 0 : index
    %81 = vector.load %arg5[%c0_108, %c0_109] : memref<200x128xf32, #tpu.memory_space<vmem>>, vector<97x128xf32>
    %c144 = arith.constant 144 : index
    %c0_110 = arith.constant 0 : index
    %82 = vector.load %arg2[%c144, %c0_110] : memref<344x256xf32, #tpu.memory_space<vmem>>, vector<128x97xf32>
    %cst_111 = arith.constant dense<0.000000e+00> : vector<128x128xf32>
    %83 = tpu.matmul %82, %81, %cst_111 {dimension_numbers = #tpu.dot_dimension_numbers<[1], [0], [0], [1], [0, 0, 1, 1], [], []>} : vector<128x97xf32>, vector<97x128xf32>, vector<128x128xf32> -> vector<128x128xf32>
    %84 = vector.extract_strided_slice %83 {offsets = [0, 0], sizes = [64, 128], strides = [1, 1]} : vector<128x128xf32> to vector<64x128xf32>
    %cst_112 = arith.constant 0.000000e+00 : f32
    %85 = vector.broadcast %cst_112 : f32 to vector<64x128xf32>
    %86 = arith.maximumf %84, %85 : vector<64x128xf32>
    %87 = vector.extract_strided_slice %83 {offsets = [64, 0], sizes = [64, 128], strides = [1, 1]} : vector<128x128xf32> to vector<64x128xf32>
    %c0_113 = arith.constant 0 : index
    %c32_114 = arith.constant 32 : index
    %88 = vector.load %arg4[%c0_113, %c32_114] : memref<64x192xf32, #tpu.memory_space<vmem>>, vector<64x128xf32>
    tpu.vector_store %arg4[%c0_113, %c32_114], %86 {strides = array<i32>} : memref<64x192xf32, #tpu.memory_space<vmem>>, vector<64x128xf32>,
    %c0_115 = arith.constant 0 : index
    %c0_116 = arith.constant 0 : index
    %89 = vector.load %arg4[%c0_115, %c0_116] : memref<64x192xf32, #tpu.memory_space<vmem>>, vector<64x128xf32>
    %c0_117 = arith.constant 0 : index
    %c0_118 = arith.constant 0 : index
    %90 = vector.load %arg5[%c0_117, %c0_118] : memref<200x128xf32, #tpu.memory_space<vmem>>, vector<64x128xf32>
    tpu.vector_store %arg5[%c0_117, %c0_118], %89 {strides = array<i32>} : memref<200x128xf32, #tpu.memory_space<vmem>>, vector<64x128xf32>,
    %c0_119 = arith.constant 0 : index
    %c32_120 = arith.constant 32 : index
    %91 = vector.load %arg4[%c0_119, %c32_120] : memref<64x192xf32, #tpu.memory_space<vmem>>, vector<64x128xf32>
    %c64_121 = arith.constant 64 : index
    %c0_122 = arith.constant 0 : index
    %92 = vector.load %arg5[%c64_121, %c0_122] : memref<200x128xf32, #tpu.memory_space<vmem>>, vector<64x128xf32>
    tpu.vector_store %arg5[%c64_121, %c0_122], %91 {strides = array<i32>} : memref<200x128xf32, #tpu.memory_space<vmem>>, vector<64x128xf32>,
    %c0_123 = arith.constant 0 : index
    %c64_124 = arith.constant 64 : index
    %93 = vector.load %arg4[%c0_123, %c64_124] : memref<64x192xf32, #tpu.memory_space<vmem>>, vector<64x128xf32>
    %c128 = arith.constant 128 : index
    %c0_125 = arith.constant 0 : index
    %94 = vector.load %arg5[%c128, %c0_125] : memref<200x128xf32, #tpu.memory_space<vmem>>, vector<64x128xf32>
    tpu.vector_store %arg5[%c128, %c0_125], %93 {strides = array<i32>} : memref<200x128xf32, #tpu.memory_space<vmem>>, vector<64x128xf32>,
    %cst_126 = arith.constant 1.000000e+00 : f32
    %95 = vector.broadcast %cst_126 : f32 to vector<1x128xf32>
    %c192 = arith.constant 192 : index
    %c0_127 = arith.constant 0 : index
    %96 = vector.load %arg5[%c192, %c0_127] : memref<200x128xf32, #tpu.memory_space<vmem>>, vector<1x128xf32>
    tpu.vector_store %arg5[%c192, %c0_127], %95 {strides = array<i32>} : memref<200x128xf32, #tpu.memory_space<vmem>>, vector<1x128xf32>,
    %c0_128 = arith.constant 0 : index
    %c0_129 = arith.constant 0 : index
    %97 = vector.load %arg5[%c0_128, %c0_129] : memref<200x128xf32, #tpu.memory_space<vmem>>, vector<193x128xf32>
    %c272 = arith.constant 272 : index
    %c0_130 = arith.constant 0 : index
    %98 = vector.load %arg2[%c272, %c0_130] : memref<344x256xf32, #tpu.memory_space<vmem>>, vector<64x193xf32>
    %cst_131 = arith.constant dense<0.000000e+00> : vector<64x128xf32>
    %99 = tpu.matmul %98, %97, %cst_131 {dimension_numbers = #tpu.dot_dimension_numbers<[1], [0], [0], [1], [0, 0, 1, 1], [], []>} : vector<64x193xf32>, vector<193x128xf32>, vector<64x128xf32> -> vector<64x128xf32>
    %cst_132 = arith.constant 0.000000e+00 : f32
    %100 = vector.broadcast %cst_132 : f32 to vector<64x128xf32>
    %101 = arith.maximumf %99, %100 : vector<64x128xf32>
    %102 = arith.addf %101, %87 : vector<64x128xf32>
    %cst_133 = arith.constant 0.000000e+00 : f32
    %103 = vector.broadcast %cst_133 : f32 to vector<64x128xf32>
    %104 = arith.maximumf %102, %103 : vector<64x128xf32>
    %105 = vector.extract_strided_slice %104 {offsets = [0, 120], sizes = [64, 8], strides = [1, 1]} : vector<64x128xf32> to vector<64x8xf32>
    %c336 = arith.constant 336 : index
    %c0_134 = arith.constant 0 : index
    %106 = vector.load %arg2[%c336, %c0_134] : memref<344x256xf32, #tpu.memory_space<vmem>>, vector<1x64xf32>
    %c336_135 = arith.constant 336 : index
    %c64_136 = arith.constant 64 : index
    %107 = vector.load %arg2[%c336_135, %c64_136] : memref<344x256xf32, #tpu.memory_space<vmem>>, vector<1x1xf32>
    %cst_137 = arith.constant dense<0.000000e+00> : vector<1x8xf32>
    %108 = tpu.matmul %106, %105, %cst_137 {dimension_numbers = #tpu.dot_dimension_numbers<[1], [0], [0], [1], [0, 0, 1, 1], [], []>} : vector<1x64xf32>, vector<64x8xf32>, vector<1x8xf32> -> vector<1x8xf32>
    %109 = vector.broadcast %107 : vector<1x1xf32> to vector<1x8xf32>
    %110 = arith.addf %108, %109 : vector<1x8xf32>
    %c0_138 = arith.constant 0 : index
    %c0_139 = arith.constant 0 : index
    %c0_140 = arith.constant 0 : index
    %111 = vector.load %arg3[%c0_138, %c0_139, %c0_140] : memref<1x1x8xf32, #tpu.memory_space<vmem>>, vector<1x1x8xf32>
    %112 = vector.shape_cast %111 : vector<1x1x8xf32> to vector<1x8xf32>
    %113 = vector.shape_cast %110 : vector<1x8xf32> to vector<1x1x8xf32>
    tpu.vector_store %arg3[%c0_138, %c0_139, %c0_140], %113 {strides = array<i32>} : memref<1x1x8xf32, #tpu.memory_space<vmem>>, vector<1x1x8xf32>,
    return
  }
  func.func @transform_0(%arg0: i32) -> (i32, i32, i32) {
    %c0_i32 = arith.constant 0 : i32
    %c0_i32_0 = arith.constant 0 : i32
    %c0_i32_1 = arith.constant 0 : i32
    return %arg0, %c0_i32, %c0_i32_0 : i32, i32, i32
  }
  func.func @transform_1(%arg0: i32) -> (i32, i32) {
    %c0_i32 = arith.constant 0 : i32
    %c0_i32_0 = arith.constant 0 : i32
    %c0_i32_1 = arith.constant 0 : i32
    return %c0_i32, %c0_i32_0 : i32, i32
  }
  func.func @transform_2(%arg0: i32) -> (i32, i32, i32) {
    %c0_i32 = arith.constant 0 : i32
    %c0_i32_0 = arith.constant 0 : i32
    %c0_i32_1 = arith.constant 0 : i32
    return %arg0, %c0_i32, %c0_i32_0 : i32, i32, i32
  }
}

</mosaic_0001>

<bundles_post_ra>
// kernel: tpu_custom_call.1
= control target key start
LH: loop header
LB: loop body
LE: loop exit
PB: predicated region body
PF: predicated region fallthrough
CT: control target
= control target key end

     0   :  { %7 = vsyncpa [#allocation5], 0  ;;  %s2473_s0 = inlined_call_operand.hbm [shape: f32[2,8,128], index: 0, kind: input, shape index: {}]   ;;  %s2474_s1 = inlined_call_operand.hbm [shape: f32[344,256], index: 1, kind: input, shape index: {}]   ;;  %s2475_s2 = inlined_call_operand.hbm [shape: f32[2,1,8], index: 2, kind: output, shape index: {}]  }
   0x1   :  { %9 = vsyncpa [#allocation5 + $0x1], 0 }
   0x2   :  { %10 = vsyncpa [#allocation8], 0 }
   0x3   :  { %11 = vsyncpa [#allocation6], 0 }
   0x4   :  { %13 = vsyncpa [#allocation6 + $0x1], 0  ;;  %s1990_s9 = smov 0   ;;  %s1992_s10 = smov 0  }
   0x5   :  { %s1994_s11 = smov 0   ;;  %s1996_s12 = smov 0  }
   0x6 LB: > { %s108_s15 = sshll.u32 %s2474_s1, 4  ;;  %s2014_s16 = sadd.s32 4294967295, %s1959_s12   ;;  %s1959_s12 = sphi %s1996_s12, %s2485_s12   ;;  %s1955_s11 = sphi %s1994_s11, %s2484_s11   ;;  %s1951_s10 = sphi %s1992_s10, %s2483_s10   ;;  %s1947_s9 = sphi %s1990_s9, %s2482_s9   ;;  %s109_s15 = int_to_ptr.hbm [resolvable:$true] %s108_s15 }
   0x7   : > { %p1665_p0 = scmp.ge.s32.totalorder %s1959_s12, 1  ;;  %p40_p1 = scmp.eq.s32.totalorder %s2014_s16, 0 }
   0x8   : > { %p97_p2 = scmp.lt.s32.totalorder %s1959_s12, 3  ;;  %s1961_s18 = smov [#allocation7]  }
   0x9   : > { %s110_s19 = sshll.u32 %s1961_s18, 4  ;;  %s1962_s20 = smov 256   ;;  %s111_s19 = int_to_ptr.vmem [resolvable:$true] %s110_s19 }
   0xa   : > { %p2019_p3 = pnand %p1665_p0, %p97_p2  ;;  %s1963_s21 = smov 16  }
   0xb   : > { %s1664_s22 = sadd.s32 4294967294, %s1959_s12   ;;  %s2030_s23 = sadd.s32 1, %s1959_s12  }
   0xc   : > { %p1745_p4 = pneg %p2019_p3  ;;  %s26_s24 = sadd.s32 1, %s1955_s11 }
   0xd   : > { %s23_s25 = ssub.s32 %s1959_s12, %s2030_s23  ;;  %p33_p7 = scmp.ne.s32.totalorder %s1955_s11, %s1951_s10 }
   0xe   : > { %p1746_p6 = pnand %p1745_p4, %p40_p1  ;;  %p24_p8 = scmp.eq.s32.totalorder %s23_s25, 0 }
   0xf   : > { %p34_p9 = scmp.eq.s32.totalorder %s1959_s12, 0  ;;  %p39_p10 = scmp.ne.s32.totalorder %s1951_s10, %s1947_s9 }
  0x10   : > { %1748 = dma.hbm_to_vmem [thread:$0]  (!%p1746_p6), %s109_s15, 11008, %s111_s19, [#allocation8], %s1962_s20, %s1962_s20, %s1963_s21  }
  0x11   : > { %p84_p11 = scmp.eq.s32.totalorder %s2014_s16, 1  ;;  %p2046_p12 = por %p40_p1, %p39_p10 }
  0x12   : > { %s2042_s26 = scalar_select %p24_p8, %s1955_s11, %s26_s24  }
  0x13   : > { %p2050_p13 = por %p84_p11, %p33_p7  ;;  %p90_p0 = scmp.eq.s32.totalorder %s1664_s22, 1 }
  0x14   : > { %p35_p2 = por %p34_p9, %p33_p7  ;;  %s124_s29 = sand.u32 1, %s1955_s11  }
  0x15   : > { %p2055_p4 = por %p90_p0, %p39_p10  ;;  %p1758_p6 = scmp.lt.s32.totalorder %s1959_s12, 2 }
  0x16   : > { %s1668_s3 = sshll.u32 %s124_s29, 3  ;;  %s1669_s4 = sshll.u32 %s1959_s12, 3 }
  0x17   : > { %s132_s7 = scalar_lea.hbm %s2473_s0, %s1669_s4  ;;  %s128_s13 = scalar_lea.vmem [#allocation4], %s1668_s3 }
  0x18   : > { %s134_s8 = sshll.u32 %s132_s7, 4  ;;  %s136_s14 = sshll.u32 %s128_s13, 4  ;;  %s135_s8 = int_to_ptr.hbm [resolvable:$true] %s134_s8  ;;  %s137_s14 = int_to_ptr.vmem [resolvable:$true] %s136_s14 }
  0x19   : > { %p2064_p8 = pnand %p1758_p6, %p35_p2  ;;  %s125_s18 = scalar_lea.sflag [#allocation5], %s124_s29 }
  0x1a   : > { %s1859_s19 = sshra.s32 %s135_s8, 4  ;;  %s1866_s24 = scalar_lea.hbm %s2473_s0, 16  ;;  %s1860_s19 = int_to_ptr.hbm [resolvable:$true] %s1859_s19 }
  0x1b   : > { %s1861_s20 = scalar_lea.hbm %s1860_s19, 8  ;;  %p1863_p9 = pneg %p2064_p8 }
  0x1c   : > { %p1862_p7 = scmp.ne.s32.totalorder %s1860_s19, %s1861_s20  ;;  %p1867_p0 = scmp.lt.s32.totalorder %s1860_s19, %s2473_s0 }
  0x1d   : > { %p1868_p2 = scmp.lt.s32.totalorder %s1866_s24, %s1861_s20 }
  0x1e   : > { %p1864_p10 = pnand %p1863_p9, %p1862_p7 }
  0x1f   : > { %p1869_p6 = por %p1868_p2, %p1867_p0 }
  0x20   : > { %p1865_p11 = pneg %p1864_p10 }
  0x22   : > { %p1870_p5 = pnand %p1869_p6, %p1865_p11 }
  0x24   : > { %1873 = shalt.err (!%p1870_p5)
}
  0x25   : > { %1752 = dma.hbm_to_vmem [thread:$0]  (!%p2064_p8), %s135_s8, 128, %s137_s14, %s125_s18  }
  0x26   : > { %145 = sbr.rel (%p2019_p3) target bundleno = 2914 (0xb62), region = 28  ;;  %s2081_s29 = sand.u32 (!%p2019_p3), 1, %s1951_s10  }
  0x27   : > { %s1671_s4 = sshll.u32 (!%p2019_p3), %s2081_s29, 3  ;;  %s148_s5 = scalar_lea.sflag (!%p2019_p3), [#allocation5], %s2081_s29 }
  0x28   : > { %s151_s6 = scalar_lea.vmem (!%p2019_p3), [#allocation4], %s1671_s4 }
  0x2b   : > { %1934 = dma.done.wait (%p2046_p12), %s148_s5, 128  }
  0x2c   : > { %1936 = vsyncadd (%p2046_p12), %s148_s5, 4294967168 }
  0x2d   : > { %1938 = dma.done.wait (%p40_p1), [#allocation8], 11008  }
  0x2e   : > { %1940 = vsyncadd (%p40_p1), [#allocation8], 4294956288  ;;  %vm177_vm0 = vcmask 261120   ;;  %vm186_vm1 = vcmask 523520   ;;  %v1964_v0 = vmov 0.0   ;;  %v195_v1 = vld [vmem:[%s151_s6] sm:$0xff]  ;;  %s1584_s21 = scalar_lea.hbm %s2475_s2, %s2014_s16 }
  0x2f   : > { %178 = vst.msk [vmem:[#allocation2] sm:$0xff] %vm177_vm0, %v1964_v0  ;;  %s1965_s17 = smov 32   ;;  %vm200_vm2 = vcmask 1047808   ;;  %s1966_s27 = smov 88   ;;  %v1969_v5 = vmov 1.0   ;;  %vm261_vm3 = vcmask 1040384  }
  0x30   : > { %187 = vst.msk [vmem:[#allocation2 + $0x8] sm:$0xff] %vm186_vm1, %v1964_v0  ;;  %197 = vrot.lane.b32.xlu0 %v195_v1, %s1965_s17  ;;  %s1967_s7 = smov 96   ;;  %s1968_s8 = smov 104   ;;  %vm235_vm4 = vcmask 719872   ;;  %vm223_vm5 = vcmask 785408   ;;  %vm211_vm6 = vcmask 850944  }
  0x31   : > { %179 = vst.msk [vmem:[#allocation2 + $0x10] sm:$0xff] %vm177_vm0, %v1964_v0  ;;  %v244_v15 = vld [vmem:[#allocation7] sm:$0xff]  ;;  %vm248_vm7 = vcmask 203776   ;;  %v245_v17 = vld [vmem:[#allocation7 + $0x10] sm:$0xff]  ;;  %vm384_vm8 = vcmask 400384   ;;  %s1970_s13 = smov 80  }
  0x32   : > { %180 = vst.msk [vmem:[#allocation2 + $0x20] sm:$0xff] %vm177_vm0, %v1964_v0  ;;  %v246_v30 = vld [vmem:[#allocation7 + $0x20] sm:$0xff]  ;;  %v247_v34 = vld [vmem:[#allocation7 + $0x30] sm:$0xff]  ;;  %s1971_s14 = smov 112   ;;  %vm496_vm9 = vcmask 654336   ;;  %vm451_vm10 = vcmask 916480  }
  0x33   : > { %181 = vst.msk [vmem:[#allocation2 + $0x30] sm:$0xff] %vm177_vm0, %v1964_v0  ;;  %v382_v48 = vld [vmem:[#allocation7 + $0x40] sm:$0xff]  ;;  %v383_v50 = vld [vmem:[#allocation7 + $0x50] sm:$0xff]  ;;  %vm765_vm11 = vcmask 793600   ;;  %s1972_s15 = smov 64   ;;  %vm930_vm12 = vcmask 523264  }
  0x34   : > { %182 = vst.msk [vmem:[#allocation2 + $0x40] sm:$0xff] %vm177_vm0, %v1964_v0  ;;  %vm1379_vm13 = vcmask 531456   ;;  %s1973_s18 = smov 8   ;;  %s176_s22 = scalar_lea.vmem [#allocation9], %s2081_s29  ;;  %vm1573_vm14 = vcmask 57344  }
  0x35   : > { %183 = vst.msk [vmem:[#allocation2 + $0x50] sm:$0xff] %vm177_vm0, %v1964_v0  ;;  %s1586_s24 = sshll.u32 %s176_s22, 4  ;;  %s1588_s25 = sshll.u32 %s1584_s21, 4  ;;  %s1587_s24 = int_to_ptr.vmem [resolvable:$true] %s1586_s24  ;;  %s1589_s25 = int_to_ptr.hbm [resolvable:$true] %s1588_s25 }
  0x36   : > { %184 = vst.msk [vmem:[#allocation2 + $0x60] sm:$0xff] %vm177_vm0, %v1964_v0  ;;  %s1576_s3 = scalar_lea.sflag [#allocation6], %s2081_s29  ;;  %s1903_s4 = sshra.s32 %s1589_s25, 4  ;;  %s1904_s4 = int_to_ptr.hbm [resolvable:$true] %s1903_s4 }
  0x37   : > { %185 = vst.msk [vmem:[#allocation2 + $0x70] sm:$0xff] %vm177_vm0, %v1964_v0  ;;  %s1905_s5 = scalar_lea.hbm %s1904_s4, 1  ;;  %p1910_p12 = scmp.lt.s32.totalorder %s1904_s4, %s2475_s2 }
  0x38   : > { %188 = vst.msk [vmem:[#allocation2 + $0x18] sm:$0xff] %vm186_vm1, %v1964_v0  ;;  %p1906_p1 = scmp.ne.s32.totalorder %s1904_s4, %s1905_s5 }
  0x39   : > { %189 = vst.msk [vmem:[#allocation2 + $0x28] sm:$0xff] %vm186_vm1, %v1964_v0 }
  0x3a   : > { %190 = vst.msk [vmem:[#allocation2 + $0x38] sm:$0xff] %vm186_vm1, %v1964_v0  ;;  %p1907_p3 = pnand %p1906_p1, %p2050_p13 }
  0x3b   : > { %191 = vst.msk [vmem:[#allocation2 + $0x48] sm:$0xff] %vm186_vm1, %v1964_v0 }
  0x3c   : > { %192 = vst.msk [vmem:[#allocation2 + $0x58] sm:$0xff] %vm186_vm1, %v1964_v0  ;;  %p1908_p5 = pneg %p1907_p3 }
  0x3d   : > { %193 = vst.msk [vmem:[#allocation2 + $0x68] sm:$0xff] %vm186_vm1, %v1964_v0 }
  0x3e   : > { %194 = vst.msk [vmem:[#allocation2 + $0x78] sm:$0xff] %vm186_vm1, %v1964_v0 }
  0x3f   : > { %239 = vst [vmem:[#allocation3 + $0x48] sm:$0x1] %v1969_v5 }
  0x40   : > { %374 = vst [vmem:[#allocation3 + $0x40] sm:$0x1] %v1969_v5 }
  0x41   : > { %747 = vst [vmem:[#allocation3 + $0x18] sm:$0x1] %v1969_v5 }
  0x42   : > { %1337 = vst [vmem:[#allocation3 + $0xc0] sm:$0x1] %v1969_v5 }
  0x46   : > { %v243_v6 = vld [vmem:[#allocation3 + $0x48] sm:$0x1] }
  0x47   : > { %1673 = vmatpush.msk.msra.mxu0 %vm261_vm3, %v243_v6  ;;  %v381_v28 = vld [vmem:[#allocation3 + $0x40] sm:$0x1] }
  0x48   : > { %1678 = vmatpush.msk.msra.mxu1 %vm261_vm3, %v381_v28  ;;  %503 = vst [vmem:[#allocation3 + $0x40] sm:$0x1] %v1969_v5 }
  0xa2   : > { %v198_v2 = vpop.permute.xlu0 %197 }
  0xa3   : > { %201 = vst.msk [vmem:[#allocation2] sm:$0xff] %vm200_vm2, %v198_v2 }
  0xa4   : > { %202 = vst.msk [vmem:[#allocation2 + $0x8] sm:$0xff] %vm177_vm0, %v198_v2 }
  0xaa   : > { %v227_v3 = vld [vmem:[#allocation2] sm:$0xff] }
  0xab   : > { %v228_v4 = vld [vmem:[#allocation2 + $0x8] sm:$0xff]  ;;  %231 = vrot.lane.b32.xlu0 %v227_v3, %s1966_s27 }
  0xac   : > { %233 = vrot.lane.b32.xlu1 %v228_v4, %s1966_s27  ;;  %221 = vrot.lane.b32.xlu2 %v228_v4, %s1967_s7 }
  0xb3   : > { %209 = vrot.lane.b32.xlu0 %v228_v4, %s1968_s8 }
  0xb4   : > { %219 = vrot.lane.b32.xlu1 %v227_v3, %s1967_s7  ;;  %207 = vrot.lane.b32.xlu2 %v227_v3, %s1968_s8  ;;  %v510_v3 = vld [vmem:[#allocation3 + $0x40] sm:$0x1] }
  0xb5   : > { %1681 = vmatpush.msk.msra.mxu2 %vm261_vm3, %v510_v3 }
 0x106   : > { %v222_v8 = vpop.permute.xlu2 %221 }
 0x10e   : > { %v208_v14 = vpop.permute.xlu2 %207 }
 0x11d   : > { %v232_v7 = vpop.permute.xlu0 %231 }
 0x11e   : > { %v234_v9 = vpop.permute.xlu1 %233 }
 0x11f   : > { %v236_v10 = vsel %vm235_vm4, %v232_v7, %v234_v9 }
 0x120   : > { %278 = vmatpush.msra.mxu0 %v236_v10 }
 0x125   : > { %v210_v11 = vpop.permute.xlu0 %209 }
 0x126   : > { %v220_v12 = vpop.permute.xlu1 %219  ;;  %v212_v16 = vsel %vm211_vm6, %v208_v14, %v210_v11 }
 0x127   : > { %v224_v13 = vsel %vm223_vm5, %v220_v12, %v222_v8 }
 0x128   : > { %279 = vmatpush.msra.mxu0 %v224_v13 }
 0x12a   : > { %280 = vmatpush.msra.mxu0 %v212_v16 }
 0x12b   : > { %1674 = vmatmul.msk.f32.vlgmr.msra.gmra.mxu0 %vm248_vm7, %v244_v15 }
 0x133   : > { %1675 = vmatmul.msk.f32.gmra.mxu0 %vm248_vm7, %v245_v17 }
 0x13b   : > { %1676 = vmatmul.msk.f32.gmra.mxu0 %vm248_vm7, %v246_v30 }
 0x143   : > { %1677 = vmatmul.msk.f32.gmra.mxu0 %vm248_vm7, %v247_v34 }
 0x1a8   : > { %v282_v18 = vpop.f32.mrf.mxu0 }
 0x1a9   : > { %v294_v19 = vmax.f32 %v282_v18, 0.0 }
 0x1ab   : > { %298 = vrot.lane.b32.xlu2 %v294_v19, %s1965_s17 }
 0x1b0   : > { %v285_v20 = vpop.f32.mrf.mxu0 }
 0x1b1   : > { %v295_v21 = vmax.f32 %v285_v20, 0.0 }
 0x1b3   : > { %300 = vrot.lane.b32.xlu1 %v295_v21, %s1965_s17 }
 0x1b8   : > { %v288_v51 = vpop.f32.mrf.mxu0 }
 0x1c0   : > { %v291_v57 = vpop.f32.mrf.mxu0 }
 0x205   : > { %v299_v22 = vpop.permute.xlu2 %298 }
 0x206   : > { %304 = vst.msk [vmem:[#allocation2] sm:$0xff] %vm200_vm2, %v299_v22 }
 0x207   : > { %305 = vst.msk [vmem:[#allocation2 + $0x8] sm:$0xff] %vm177_vm0, %v299_v22  ;;  %v511_v22 = vld [vmem:[#allocation7 + $0x60] sm:$0xff] }
 0x20d   : > { %v352_v23 = vld [vmem:[#allocation2] sm:$0xff] }
 0x20e   : > { %v353_v24 = vld [vmem:[#allocation2 + $0x8] sm:$0xff]  ;;  %360 = vrot.lane.b32.xlu2 %v352_v23, %s1966_s27 }
 0x20f   : > { %362 = vrot.lane.b32.xlu0 %v353_v24, %s1966_s27  ;;  %340 = vrot.lane.b32.xlu1 %v353_v24, %s1967_s7 }
 0x217   : > { %338 = vrot.lane.b32.xlu0 %v352_v23, %s1967_s7 }
 0x225   : > { %v301_v25 = vpop.permute.xlu1 %300 }
 0x226   : > { %306 = vst.msk [vmem:[#allocation2 + $0x10] sm:$0xff] %vm200_vm2, %v301_v25 }
 0x227   : > { %307 = vst.msk [vmem:[#allocation2 + $0x18] sm:$0xff] %vm177_vm0, %v301_v25  ;;  %v513_v25 = vld [vmem:[#allocation7 + $0x80] sm:$0xff] }
 0x22d   : > { %v354_v26 = vld [vmem:[#allocation2 + $0x10] sm:$0xff] }
 0x22e   : > { %v355_v27 = vld [vmem:[#allocation2 + $0x18] sm:$0xff]  ;;  %364 = vrot.lane.b32.xlu0 %v354_v26, %s1966_s27 }
 0x22f   : > { %366 = vrot.lane.b32.xlu1 %v355_v27, %s1966_s27  ;;  %344 = vrot.lane.b32.xlu2 %v355_v27, %s1967_s7 }
 0x236   : > { %322 = vrot.lane.b32.xlu0 %v355_v27, %s1968_s8 }
 0x237   : > { %342 = vrot.lane.b32.xlu1 %v354_v26, %s1967_s7  ;;  %320 = vrot.lane.b32.xlu2 %v354_v26, %s1968_s8  ;;  %v514_v26 = vld [vmem:[#allocation7 + $0x90] sm:$0xff] }
 0x23f   : > { %316 = vrot.lane.b32.xlu1 %v352_v23, %s1968_s8  ;;  %318 = vrot.lane.b32.xlu2 %v353_v24, %s1968_s8  ;;  %v512_v24 = vld [vmem:[#allocation7 + $0x70] sm:$0xff] }
 0x268   : > { %v361_v31 = vpop.permute.xlu2 %360 }
 0x281   : > { %v363_v29 = vpop.permute.xlu0 %362  ;;  %v341_v33 = vpop.permute.xlu1 %340 }
 0x282   : > { %v368_v39 = vsel %vm235_vm4, %v361_v31, %v363_v29 }
 0x289   : > { %v339_v32 = vpop.permute.xlu0 %338  ;;  %v345_v35 = vpop.permute.xlu2 %344 }
 0x28a   : > { %v346_v44 = vsel %vm223_vm5, %v339_v32, %v341_v33 }
 0x291   : > { %v321_v40 = vpop.permute.xlu2 %320 }
 0x299   : > { %v319_v46 = vpop.permute.xlu2 %318 }
 0x2a0   : > { %v365_v36 = vpop.permute.xlu0 %364 }
 0x2a1   : > { %v367_v37 = vpop.permute.xlu1 %366 }
 0x2a2   : > { %v369_v38 = vsel %vm235_vm4, %v365_v36, %v367_v37 }
 0x2a3   : > { %404 = vmatpush.msra.mxu1 %v369_v38 }
 0x2a5   : > { %405 = vmatpush.msra.mxu1 %v368_v39 }
 0x2a8   : > { %v323_v43 = vpop.permute.xlu0 %322 }
 0x2a9   : > { %v343_v41 = vpop.permute.xlu1 %342  ;;  %v325_v45 = vsel %vm211_vm6, %v321_v40, %v323_v43 }
 0x2aa   : > { %v347_v42 = vsel %vm223_vm5, %v343_v41, %v345_v35 }
 0x2ab   : > { %406 = vmatpush.msra.mxu1 %v347_v42 }
 0x2ad   : > { %407 = vmatpush.msra.mxu1 %v346_v44 }
 0x2af   : > { %408 = vmatpush.msra.mxu1 %v325_v45 }
 0x2b1   : > { %v317_v47 = vpop.permute.xlu1 %316 }
 0x2b2   : > { %v324_v49 = vsel %vm211_vm6, %v317_v47, %v319_v46 }
 0x2b3   : > { %409 = vmatpush.msra.mxu1 %v324_v49 }
 0x2b4   : > { %1679 = vmatmul.msk.f32.vlgmr.msra.gmra.mxu1 %vm384_vm8, %v382_v48 }
 0x2bc   : > { %1680 = vmatmul.msk.f32.gmra.mxu1 %vm384_vm8, %v383_v50  ;;  %v760_v50 = vld [vmem:[#allocation3 + $0x18] sm:$0x1] }
 0x2bd   : > { %1690 = vmatpush.msk.msra.mxu3 %vm261_vm3, %v760_v50  ;;  %943 = vst [vmem:[#allocation3 + $0x18] sm:$0x1] %v1969_v5  ;;  %v516_v5 = vld [vmem:[#allocation7 + $0xb0] sm:$0xff] }
 0x331   : > { %v411_v52 = vpop.f32.mrf.mxu1 }
 0x332   : > { %v417_v53 = vmax.f32 %v411_v52, 0.0 }
 0x334   : > { %v419_v54 = vadd.f32 %v417_v53, %v288_v51 }
 0x336   : > { %v421_v55 = vmax.f32 %v419_v54, 0.0 }
 0x338   : > { %425 = vrot.lane.b32.xlu1 %v421_v55, %s1965_s17 }
 0x339   : > { %v414_v56 = vpop.f32.mrf.mxu1 }
 0x33a   : > { %v418_v58 = vmax.f32 %v414_v56, 0.0 }
 0x33c   : > { %v420_v59 = vadd.f32 %v418_v58, %v291_v57 }
 0x33e   : > { %v422_v60 = vmax.f32 %v420_v59, 0.0 }
 0x340   : > { %427 = vrot.lane.b32.xlu0 %v422_v60, %s1965_s17 }
 0x3aa   : > { %v426_v61 = vpop.permute.xlu1 %425 }
 0x3ab   : > { %431 = vst.msk [vmem:[#allocation2] sm:$0xff] %vm200_vm2, %v426_v61 }
 0x3ac   : > { %432 = vst.msk [vmem:[#allocation2 + $0x8] sm:$0xff] %vm177_vm0, %v426_v61  ;;  %v515_v61 = vld [vmem:[#allocation7 + $0xa0] sm:$0xff] }
 0x3b2   : > { %v428_v62 = vpop.permute.xlu0 %427  ;;  %v480_v63 = vld [vmem:[#allocation2] sm:$0xff] }
 0x3b3   : > { %433 = vst.msk [vmem:[#allocation2 + $0x10] sm:$0xff] %vm200_vm2, %v428_v62  ;;  %v481_v0 = vld [vmem:[#allocation2 + $0x8] sm:$0xff]  ;;  %488 = vrot.lane.b32.xlu1 %v480_v63, %s1970_s13 }
 0x3b4   : > { %434 = vst.msk [vmem:[#allocation2 + $0x18] sm:$0xff] %vm177_vm0, %v428_v62  ;;  %490 = vrot.lane.b32.xlu2 %v481_v0, %s1970_s13  ;;  %468 = vrot.lane.b32.xlu0 %v481_v0, %s1967_s7 }
 0x3ba   : > { %v482_v2 = vld [vmem:[#allocation2 + $0x10] sm:$0xff] }
 0x3bb   : > { %v483_v1 = vld [vmem:[#allocation2 + $0x18] sm:$0xff] }
 0x3bc   : > { %466 = vrot.lane.b32.xlu2 %v480_v63, %s1967_s7  ;;  %494 = vrot.lane.b32.xlu0 %v483_v1, %s1970_s13 }
 0x3bd   : > { %472 = vrot.lane.b32.xlu1 %v483_v1, %s1967_s7 }
 0x3c4   : > { %492 = vrot.lane.b32.xlu2 %v482_v2, %s1970_s13  ;;  %470 = vrot.lane.b32.xlu0 %v482_v2, %s1967_s7 }
 0x3c5   : > { %447 = vrot.lane.b32.xlu1 %v482_v2, %s1971_s14 }
 0x3cc   : > { %449 = vrot.lane.b32.xlu2 %v483_v1, %s1971_s14  ;;  %443 = vrot.lane.b32.xlu0 %v480_v63, %s1971_s14 }
 0x3cd   : > { %445 = vrot.lane.b32.xlu1 %v481_v0, %s1971_s14 }
 0x40e   : > { %v491_v4 = vpop.permute.xlu2 %490 }
 0x416   : > { %v467_v6 = vpop.permute.xlu2 %466 }
 0x41e   : > { %v493_v9 = vpop.permute.xlu2 %492 }
 0x425   : > { %v489_v7 = vpop.permute.xlu1 %488 }
 0x426   : > { %v469_v8 = vpop.permute.xlu0 %468  ;;  %v497_v13 = vsel %vm496_vm9, %v489_v7, %v491_v4  ;;  %v450_v18 = vpop.permute.xlu2 %449 }
 0x427   : > { %v474_v17 = vsel %vm223_vm5, %v467_v6, %v469_v8 }
 0x42e   : > { %v495_v10 = vpop.permute.xlu0 %494 }
 0x42f   : > { %v473_v11 = vpop.permute.xlu1 %472  ;;  %v498_v12 = vsel %vm496_vm9, %v493_v9, %v495_v10  ;;  %v517_v10 = vld [vmem:[#allocation7 + $0xc0] sm:$0xff] }
 0x430   : > { %556 = vmatpush.msra.mxu2 %v498_v12 }
 0x432   : > { %557 = vmatpush.msra.mxu2 %v497_v13 }
 0x436   : > { %v471_v14 = vpop.permute.xlu0 %470 }
 0x437   : > { %v448_v15 = vpop.permute.xlu1 %447  ;;  %v475_v16 = vsel %vm223_vm5, %v471_v14, %v473_v11 }
 0x438   : > { %558 = vmatpush.msra.mxu2 %v475_v16  ;;  %v453_v19 = vsel %vm451_vm10, %v448_v15, %v450_v18  ;;  %v518_v18 = vld [vmem:[#allocation7 + $0xd0] sm:$0xff] }
 0x43a   : > { %559 = vmatpush.msra.mxu2 %v474_v17 }
 0x43c   : > { %560 = vmatpush.msra.mxu2 %v453_v19 }
 0x43e   : > { %v444_v20 = vpop.permute.xlu0 %443 }
 0x43f   : > { %v446_v21 = vpop.permute.xlu1 %445 }
 0x440   : > { %v452_v23 = vsel %vm451_vm10, %v444_v20, %v446_v21 }
 0x441   : > { %561 = vmatpush.msra.mxu2 %v452_v23  ;;  %v761_v23 = vld [vmem:[#allocation7 + $0xe0] sm:$0xff] }
 0x442   : > { %1682 = vmatmul.msk.f32.vlgmr.msra.gmra.mxu2 %vm384_vm8, %v511_v22 }
 0x44a   : > { %1683 = vmatmul.msk.f32.gmra.mxu2 %vm384_vm8, %v512_v24 }
 0x452   : > { %1684 = vmatmul.msk.f32.gmra.mxu2 %vm384_vm8, %v513_v25  ;;  %v762_v25 = vld [vmem:[#allocation7 + $0xf0] sm:$0xff] }
 0x45a   : > { %1685 = vmatmul.msk.f32.gmra.mxu2 %vm384_vm8, %v514_v26  ;;  %v763_v26 = vld [vmem:[#allocation7 + $0x100] sm:$0xff] }
 0x462   : > { %1686 = vmatmul.msk.f32.gmra.mxu2 %vm384_vm8, %v515_v61 }
 0x46a   : > { %1687 = vmatmul.msk.f32.gmra.mxu2 %vm384_vm8, %v516_v5 }
 0x472   : > { %1688 = vmatmul.msk.f32.gmra.mxu2 %vm384_vm8, %v517_v10 }
 0x47a   : > { %1689 = vmatmul.msk.f32.gmra.mxu2 %vm384_vm8, %v518_v18 }
 0x4c5   : > { %v563_v27 = vpop.f32.mrf.mxu2 }
 0x4c6   : > { %v587_v34 = vmax.f32 %v563_v27, 0.0  ;;  %v764_v27 = vld [vmem:[#allocation7 + $0x110] sm:$0xff] }
 0x4cd   : > { %v566_v28 = vpop.f32.mrf.mxu2 }
 0x4ce   : > { %v588_v29 = vmax.f32 %v566_v28, 0.0 }
 0x4d0   : > { %597 = vrot.lane.b32.xlu1 %v588_v29, %s1965_s17 }
 0x4d5   : > { %v569_v30 = vpop.f32.mrf.mxu2 }
 0x4d6   : > { %v589_v31 = vmax.f32 %v569_v30, 0.0 }
 0x4d8   : > { %599 = vrot.lane.b32.xlu0 %v589_v31, %s1965_s17 }
 0x4dd   : > { %v572_v32 = vpop.f32.mrf.mxu2 }
 0x4de   : > { %v590_v33 = vmax.f32 %v572_v32, 0.0 }
 0x4e0   : > { %601 = vrot.lane.b32.xlu2 %v590_v33, %s1965_s17 }
 0x4e5   : > { %v575_v28 = vpop.f32.mrf.mxu2 }
 0x4e8   : > { %595 = vrot.lane.b32.xlu2 %v587_v34, %s1965_s17 }
 0x4ed   : > { %v578_v30 = vpop.f32.mrf.mxu2 }
 0x53a   : > { %v602_v35 = vpop.permute.xlu2 %601 }
 0x53b   : > { %613 = vst.msk [vmem:[#allocation2 + $0x30] sm:$0xff] %vm200_vm2, %v602_v35 }
 0x53c   : > { %614 = vst.msk [vmem:[#allocation2 + $0x38] sm:$0xff] %vm177_vm0, %v602_v35  ;;  %v581_v35 = vpop.f32.mrf.mxu2 }
 0x542   : > { %v598_v36 = vpop.permute.xlu1 %597  ;;  %v596_v37 = vpop.permute.xlu2 %595  ;;  %v709_v45 = vld [vmem:[#allocation2 + $0x30] sm:$0xff] }
 0x543   : > { %609 = vst.msk [vmem:[#allocation2 + $0x10] sm:$0xff] %vm200_vm2, %v598_v36  ;;  %v710_v46 = vld [vmem:[#allocation2 + $0x38] sm:$0xff] }
 0x544   : > { %610 = vst.msk [vmem:[#allocation2 + $0x18] sm:$0xff] %vm177_vm0, %v598_v36 }
 0x545   : > { %607 = vst.msk [vmem:[#allocation2] sm:$0xff] %vm200_vm2, %v596_v37 }
 0x546   : > { %608 = vst.msk [vmem:[#allocation2 + $0x8] sm:$0xff] %vm177_vm0, %v596_v37 }
 0x54a   : > { %v600_v38 = vpop.permute.xlu0 %599  ;;  %v705_v42 = vld [vmem:[#allocation2 + $0x10] sm:$0xff] }
 0x54b   : > { %611 = vst.msk [vmem:[#allocation2 + $0x20] sm:$0xff] %vm200_vm2, %v600_v38  ;;  %v706_v41 = vld [vmem:[#allocation2 + $0x18] sm:$0xff] }
 0x54c   : > { %612 = vst.msk [vmem:[#allocation2 + $0x28] sm:$0xff] %vm177_vm0, %v600_v38  ;;  %v703_v39 = vld [vmem:[#allocation2] sm:$0xff] }
 0x54d   : > { %v704_v40 = vld [vmem:[#allocation2 + $0x8] sm:$0xff]  ;;  %719 = vrot.lane.b32.xlu0 %v703_v39, %s1970_s13  ;;  %675 = vrot.lane.b32.xlu2 %v703_v39, %s1967_s7 }
 0x54e   : > { %721 = vrot.lane.b32.xlu1 %v704_v40, %s1970_s13 }
 0x552   : > { %v707_v43 = vld [vmem:[#allocation2 + $0x20] sm:$0xff] }
 0x553   : > { %v708_v44 = vld [vmem:[#allocation2 + $0x28] sm:$0xff] }
 0x555   : > { %677 = vrot.lane.b32.xlu0 %v704_v40, %s1967_s7  ;;  %725 = vrot.lane.b32.xlu2 %v706_v41, %s1970_s13 }
 0x556   : > { %723 = vrot.lane.b32.xlu1 %v705_v42, %s1970_s13 }
 0x55d   : > { %679 = vrot.lane.b32.xlu0 %v705_v42, %s1967_s7  ;;  %727 = vrot.lane.b32.xlu2 %v707_v43, %s1970_s13 }
 0x55e   : > { %681 = vrot.lane.b32.xlu1 %v706_v41, %s1967_s7 }
 0x565   : > { %729 = vrot.lane.b32.xlu0 %v708_v44, %s1970_s13  ;;  %685 = vrot.lane.b32.xlu2 %v708_v44, %s1967_s7 }
 0x566   : > { %683 = vrot.lane.b32.xlu1 %v707_v43, %s1967_s7 }
 0x56d   : > { %731 = vrot.lane.b32.xlu0 %v709_v45, %s1970_s13  ;;  %687 = vrot.lane.b32.xlu2 %v709_v45, %s1967_s7 }
 0x56e   : > { %733 = vrot.lane.b32.xlu1 %v710_v46, %s1970_s13 }
 0x575   : > { %689 = vrot.lane.b32.xlu0 %v710_v46, %s1967_s7  ;;  %635 = vrot.lane.b32.xlu2 %v705_v42, %s1971_s14 }
 0x576   : > { %641 = vrot.lane.b32.xlu1 %v708_v44, %s1971_s14 }
 0x57d   : > { %639 = vrot.lane.b32.xlu0 %v707_v43, %s1971_s14  ;;  %645 = vrot.lane.b32.xlu2 %v710_v46, %s1971_s14 }
 0x57e   : > { %643 = vrot.lane.b32.xlu1 %v709_v45, %s1971_s14 }
 0x585   : > { %637 = vrot.lane.b32.xlu0 %v706_v41, %s1971_s14  ;;  %633 = vrot.lane.b32.xlu2 %v704_v40, %s1971_s14  ;;  %v584_v41 = vpop.f32.mrf.mxu2 }
 0x586   : > { %631 = vrot.lane.b32.xlu1 %v703_v39, %s1971_s14 }
 0x5a7   : > { %v676_v47 = vpop.permute.xlu2 %675 }
 0x5af   : > { %v726_v48 = vpop.permute.xlu2 %725 }
 0x5b7   : > { %v728_v52 = vpop.permute.xlu2 %727 }
 0x5bf   : > { %v720_v49 = vpop.permute.xlu0 %719  ;;  %v686_v57 = vpop.permute.xlu2 %685 }
 0x5c0   : > { %v722_v51 = vpop.permute.xlu1 %721 }
 0x5c1   : > { %v735_v4 = vsel %vm496_vm9, %v720_v49, %v722_v51 }
 0x5c7   : > { %v678_v53 = vpop.permute.xlu0 %677  ;;  %v688_v60 = vpop.permute.xlu2 %687 }
 0x5c8   : > { %v724_v54 = vpop.permute.xlu1 %723  ;;  %v691_v12 = vsel %vm223_vm5, %v676_v47, %v678_v53 }
 0x5c9   : > { %v736_v2 = vsel %vm496_vm9, %v724_v54, %v726_v48 }
 0x5cf   : > { %v680_v55 = vpop.permute.xlu0 %679  ;;  %v636_v3 = vpop.permute.xlu2 %635 }
 0x5d0   : > { %v682_v56 = vpop.permute.xlu1 %681 }
 0x5d1   : > { %v692_v11 = vsel %vm223_vm5, %v680_v55, %v682_v56 }
 0x5d7   : > { %v730_v58 = vpop.permute.xlu0 %729  ;;  %v646_v13 = vpop.permute.xlu2 %645 }
 0x5d8   : > { %v684_v59 = vpop.permute.xlu1 %683  ;;  %v737_v1 = vsel %vm496_vm9, %v728_v52, %v730_v58 }
 0x5d9   : > { %v693_v9 = vsel %vm223_vm5, %v684_v59, %v686_v57 }
 0x5df   : > { %v732_v62 = vpop.permute.xlu0 %731  ;;  %v634_v22 = vpop.permute.xlu2 %633 }
 0x5e0   : > { %v734_v63 = vpop.permute.xlu1 %733 }
 0x5e1   : > { %v738_v0 = vsel %vm496_vm9, %v732_v62, %v734_v63 }
 0x5e2   : > { %785 = vmatpush.msra.mxu3 %v738_v0 }
 0x5e4   : > { %786 = vmatpush.msra.mxu3 %v737_v1 }
 0x5e6   : > { %787 = vmatpush.msra.mxu3 %v736_v2 }
 0x5e7   : > { %v690_v6 = vpop.permute.xlu0 %689 }
 0x5e8   : > { %v642_v7 = vpop.permute.xlu1 %641  ;;  %v694_v8 = vsel %vm223_vm5, %v688_v60, %v690_v6  ;;  %788 = vmatpush.msra.mxu3 %v735_v4  ;;  %v956_v60 = vld [vmem:[#allocation3 + $0x18] sm:$0x1] }
 0x5e9   : > { %1695 = vmatpush.msk.msrb.mxu0 %vm261_vm3, %v956_v60  ;;  %1724 = vmatpush.msk.msrb.mxu2 %vm261_vm3, %v956_v60 }
 0x5ea   : > { %789 = vmatpush.msra.mxu3 %v694_v8 }
 0x5ec   : > { %790 = vmatpush.msra.mxu3 %v693_v9 }
 0x5ee   : > { %791 = vmatpush.msra.mxu3 %v692_v11 }
 0x5ef   : > { %v640_v14 = vpop.permute.xlu0 %639 }
 0x5f0   : > { %v644_v15 = vpop.permute.xlu1 %643  ;;  %792 = vmatpush.msra.mxu3 %v691_v12  ;;  %v649_v17 = vsel %vm451_vm10, %v640_v14, %v642_v7 }
 0x5f1   : > { %v650_v16 = vsel %vm451_vm10, %v644_v15, %v646_v13 }
 0x5f2   : > { %793 = vmatpush.msra.mxu3 %v650_v16 }
 0x5f4   : > { %794 = vmatpush.msra.mxu3 %v649_v17 }
 0x5f7   : > { %v638_v19 = vpop.permute.xlu0 %637 }
 0x5f8   : > { %v648_v20 = vsel %vm451_vm10, %v636_v3, %v638_v19  ;;  %v632_v21 = vpop.permute.xlu1 %631 }
 0x5f9   : > { %795 = vmatpush.msra.mxu3 %v648_v20  ;;  %v647_v24 = vsel %vm451_vm10, %v632_v21, %v634_v22  ;;  %v957_v21 = vld [vmem:[#allocation7 + $0x120] sm:$0xff]  ;;  %v958_v22 = vld [vmem:[#allocation7 + $0x130] sm:$0xff] }
 0x5fb   : > { %796 = vmatpush.msra.mxu3 %v647_v24  ;;  %v960_v24 = vld [vmem:[#allocation7 + $0x150] sm:$0xff] }
 0x5fc   : > { %1691 = vmatmul.msk.f32.vlgmr.msra.gmra.mxu3 %vm765_vm11, %v761_v23  ;;  %v959_v23 = vld [vmem:[#allocation7 + $0x140] sm:$0xff] }
 0x604   : > { %1692 = vmatmul.msk.f32.gmra.mxu3 %vm765_vm11, %v762_v25  ;;  %v961_v25 = vld [vmem:[#allocation7 + $0x160] sm:$0xff] }
 0x60c   : > { %1693 = vmatmul.msk.f32.gmra.mxu3 %vm765_vm11, %v763_v26  ;;  %v962_v26 = vld [vmem:[#allocation7 + $0x170] sm:$0xff] }
 0x614   : > { %1694 = vmatmul.msk.f32.gmra.mxu3 %vm765_vm11, %v764_v27  ;;  %v963_v27 = vld [vmem:[#allocation7 + $0x180] sm:$0xff] }
 0x67f   : > { %v798_v29 = vpop.f32.mrf.mxu3 }
 0x680   : > { %v810_v44 = vmax.f32 %v798_v29, 0.0 }
 0x682   : > { %v814_v46 = vadd.f32 %v810_v44, %v575_v28  ;;  %v964_v28 = vld [vmem:[#allocation7 + $0x190] sm:$0xff] }
 0x684   : > { %v818_v47 = vmax.f32 %v814_v46, 0.0 }
 0x687   : > { %v801_v31 = vpop.f32.mrf.mxu3 }
 0x688   : > { %v811_v32 = vmax.f32 %v801_v31, 0.0 }
 0x68a   : > { %v815_v33 = vadd.f32 %v811_v32, %v578_v30 }
 0x68c   : > { %v819_v34 = vmax.f32 %v815_v33, 0.0 }
 0x68e   : > { %828 = vrot.lane.b32.xlu2 %v819_v34, %s1965_s17 }
 0x68f   : > { %v804_v36 = vpop.f32.mrf.mxu3 }
 0x690   : > { %v812_v37 = vmax.f32 %v804_v36, 0.0 }
 0x692   : > { %v816_v38 = vadd.f32 %v812_v37, %v581_v35 }
 0x694   : > { %v820_v39 = vmax.f32 %v816_v38, 0.0 }
 0x696   : > { %830 = vrot.lane.b32.xlu1 %v820_v39, %s1965_s17 }
 0x697   : > { %v807_v40 = vpop.f32.mrf.mxu3 }
 0x698   : > { %v813_v42 = vmax.f32 %v807_v40, 0.0 }
 0x69a   : > { %v817_v43 = vadd.f32 %v813_v42, %v584_v41 }
 0x69c   : > { %v821_v45 = vmax.f32 %v817_v43, 0.0 }
 0x69e   : > { %832 = vrot.lane.b32.xlu0 %v821_v45, %s1965_s17 }
 0x6a6   : > { %826 = vrot.lane.b32.xlu0 %v818_v47, %s1965_s17 }
 0x6e8   : > { %v829_v48 = vpop.permute.xlu2 %828 }
 0x6e9   : > { %840 = vst.msk [vmem:[#allocation2 + $0x10] sm:$0xff] %vm200_vm2, %v829_v48 }
 0x6ea   : > { %841 = vst.msk [vmem:[#allocation2 + $0x18] sm:$0xff] %vm177_vm0, %v829_v48 }
 0x6f0   : > { %v900_v58 = vld [vmem:[#allocation2 + $0x10] sm:$0xff] }
 0x6f1   : > { %v901_v49 = vld [vmem:[#allocation2 + $0x18] sm:$0xff] }
 0x6f2   : > { %920 = vrot.lane.b32.xlu0 %v901_v49, %s1972_s15 }
 0x708   : > { %v831_v50 = vpop.permute.xlu1 %830 }
 0x709   : > { %842 = vst.msk [vmem:[#allocation2 + $0x20] sm:$0xff] %vm200_vm2, %v831_v50 }
 0x70a   : > { %843 = vst.msk [vmem:[#allocation2 + $0x28] sm:$0xff] %vm177_vm0, %v831_v50 }
 0x710   : > { %v833_v51 = vpop.permute.xlu0 %832  ;;  %v2254_v52 = vld [vmem:[#allocation2 + $0x20] sm:$0xff] }
 0x711   : > { %844 = vst.msk [vmem:[#allocation2 + $0x30] sm:$0xff] %vm200_vm2, %v833_v51  ;;  %922 = vrot.lane.b32.xlu0 %v2254_v52, %s1972_s15  ;;  %v859_v54 = vld [vmem:[#allocation2 + $0x28] sm:$0xff] }
 0x712   : > { %845 = vst.msk [vmem:[#allocation2 + $0x38] sm:$0xff] %vm177_vm0, %v833_v51 }
 0x718   : > { %v827_v53 = vpop.permute.xlu0 %826  ;;  %v860_v55 = vld [vmem:[#allocation2 + $0x30] sm:$0xff] }
 0x719   : > { %838 = vst.msk [vmem:[#allocation2] sm:$0xff] %vm200_vm2, %v827_v53  ;;  %880 = vrot.lane.b32.xlu0 %v859_v54, %s1967_s7  ;;  %v905_v59 = vld [vmem:[#allocation2 + $0x38] sm:$0xff] }
 0x71a   : > { %839 = vst.msk [vmem:[#allocation2 + $0x8] sm:$0xff] %vm177_vm0, %v827_v53 }
 0x720   : > { %v2263_v56 = vld [vmem:[#allocation2] sm:$0xff] }
 0x721   : > { %882 = vrot.lane.b32.xlu0 %v860_v55, %s1967_s7  ;;  %v899_v57 = vld [vmem:[#allocation2 + $0x8] sm:$0xff]  ;;  %914 = vrot.lane.b32.xlu1 %v2263_v56, %s1972_s15 }
 0x722   : > { %916 = vrot.lane.b32.xlu2 %v899_v57, %s1972_s15 }
 0x729   : > { %924 = vrot.lane.b32.xlu1 %v859_v54, %s1972_s15  ;;  %870 = vrot.lane.b32.xlu0 %v2263_v56, %s1967_s7 }
 0x72a   : > { %918 = vrot.lane.b32.xlu2 %v900_v58, %s1972_s15 }
 0x731   : > { %926 = vrot.lane.b32.xlu1 %v860_v55, %s1972_s15 }
 0x732   : > { %928 = vrot.lane.b32.xlu2 %v905_v59, %s1972_s15 }
 0x739   : > { %874 = vrot.lane.b32.xlu1 %v900_v58, %s1967_s7 }
 0x73a   : > { %878 = vrot.lane.b32.xlu2 %v2254_v52, %s1967_s7 }
 0x741   : > { %884 = vrot.lane.b32.xlu1 %v905_v59, %s1967_s7 }
 0x742   : > { %876 = vrot.lane.b32.xlu2 %v901_v49, %s1967_s7 }
 0x749   : > { %872 = vrot.lane.b32.xlu1 %v899_v57, %s1967_s7 }
 0x764   : > { %v921_v63 = vpop.permute.xlu0 %920 }
 0x77c   : > { %v917_v61 = vpop.permute.xlu2 %916 }
 0x783   : > { %v923_v5 = vpop.permute.xlu0 %922 }
 0x784   : > { %v919_v0 = vpop.permute.xlu2 %918 }
 0x785   : > { %v932_v8 = vsel %vm930_vm12, %v919_v0, %v921_v63 }
 0x78b   : > { %v881_v7 = vpop.permute.xlu0 %880 }
 0x78c   : > { %v929_v2 = vpop.permute.xlu2 %928 }
 0x793   : > { %v915_v62 = vpop.permute.xlu1 %914  ;;  %v883_v12 = vpop.permute.xlu0 %882 }
 0x794   : > { %v931_v9 = vsel %vm930_vm12, %v915_v62, %v917_v61  ;;  %v879_v11 = vpop.permute.xlu2 %878 }
 0x795   : > { %v888_v15 = vsel %vm223_vm5, %v879_v11, %v881_v7 }
 0x79b   : > { %v925_v1 = vpop.permute.xlu1 %924  ;;  %v871_v18 = vpop.permute.xlu0 %870 }
 0x79c   : > { %v933_v6 = vsel %vm930_vm12, %v923_v5, %v925_v1  ;;  %v877_v16 = vpop.permute.xlu2 %876 }
 0x7a3   : > { %v927_v3 = vpop.permute.xlu1 %926 }
 0x7a4   : > { %v934_v4 = vsel %vm930_vm12, %v927_v3, %v929_v2 }
 0x7a5   : > { %1028 = vmatpush.msrb.mxu0 %v934_v4  ;;  %1725 = vmatpush.msrb.mxu2 %v934_v4 }
 0x7a7   : > { %1029 = vmatpush.msrb.mxu0 %v933_v6  ;;  %1726 = vmatpush.msrb.mxu2 %v933_v6 }
 0x7a9   : > { %1030 = vmatpush.msrb.mxu0 %v932_v8  ;;  %1727 = vmatpush.msrb.mxu2 %v932_v8 }
 0x7ab   : > { %v875_v10 = vpop.permute.xlu1 %874  ;;  %1031 = vmatpush.msrb.mxu0 %v931_v9  ;;  %1728 = vmatpush.msrb.mxu2 %v931_v9 }
 0x7ac   : > { %v887_v17 = vsel %vm223_vm5, %v875_v10, %v877_v16 }
 0x7b3   : > { %v885_v13 = vpop.permute.xlu1 %884 }
 0x7b4   : > { %v889_v14 = vsel %vm223_vm5, %v883_v12, %v885_v13 }
 0x7b5   : > { %1032 = vmatpush.msrb.mxu0 %v889_v14  ;;  %1729 = vmatpush.msrb.mxu2 %v889_v14 }
 0x7b7   : > { %1033 = vmatpush.msrb.mxu0 %v888_v15  ;;  %1730 = vmatpush.msrb.mxu2 %v888_v15 }
 0x7b9   : > { %1034 = vmatpush.msrb.mxu0 %v887_v17  ;;  %1731 = vmatpush.msrb.mxu2 %v887_v17 }
 0x7bb   : > { %v873_v19 = vpop.permute.xlu1 %872 }
 0x7bc   : > { %v886_v20 = vsel %vm223_vm5, %v871_v18, %v873_v19 }
 0x7bd   : > { %1035 = vmatpush.msrb.mxu0 %v886_v20  ;;  %1732 = vmatpush.msrb.mxu2 %v886_v20 }
 0x7bf   : > { %1036 = vmatpush.msrb.mxu0 %v860_v55  ;;  %1733 = vmatpush.msrb.mxu2 %v860_v55 }
 0x7c1   : > { %1037 = vmatpush.msrb.mxu0 %v2254_v52  ;;  %1734 = vmatpush.msrb.mxu2 %v2254_v52 }
 0x7c3   : > { %1038 = vmatpush.msrb.mxu0 %v900_v58  ;;  %1735 = vmatpush.msrb.mxu2 %v900_v58 }
 0x7c5   : > { %1039 = vmatpush.msrb.mxu0 %v2263_v56  ;;  %1736 = vmatpush.msrb.mxu2 %v2263_v56 }
 0x7c6   : > { %1696 = vmatmul.msk.f32.vlgmr.msrb.gmra.mxu0 %vm765_vm11, %v957_v21 }
 0x7ce   : > { %1697 = vmatmul.msk.f32.gmra.mxu0 %vm765_vm11, %v958_v22 }
 0x7d6   : > { %1698 = vmatmul.msk.f32.gmra.mxu0 %vm765_vm11, %v959_v23 }
 0x7de   : > { %1699 = vmatmul.msk.f32.gmra.mxu0 %vm765_vm11, %v960_v24 }
 0x7e6   : > { %1700 = vmatmul.msk.f32.gmra.mxu0 %vm765_vm11, %v961_v25 }
 0x7ee   : > { %1701 = vmatmul.msk.f32.gmra.mxu0 %vm765_vm11, %v962_v26  ;;  %v1362_v26 = vld [vmem:[#allocation3 + $0xc0] sm:$0x1] }
 0x7ef   : > { %1712 = vmatpush.msk.msrb.mxu3 %vm261_vm3, %v1362_v26 }
 0x7f6   : > { %1702 = vmatmul.msk.f32.gmra.mxu0 %vm765_vm11, %v963_v27 }
 0x7fe   : > { %1703 = vmatmul.msk.f32.gmra.mxu0 %vm765_vm11, %v964_v28 }
 0x843   : > { %v1041_v29 = vpop.f32.mrf.mxu0 }
 0x844   : > { %v1089_v30 = vmax.f32 %v1041_v29, 0.0 }
 0x846   : > { %1105 = vrot.lane.b32.xlu0 %v1089_v30, %s1965_s17 }
 0x84b   : > { %v1044_v31 = vpop.f32.mrf.mxu0 }
 0x84c   : > { %v1090_v32 = vmax.f32 %v1044_v31, 0.0 }
 0x84e   : > { %1107 = vrot.lane.b32.xlu2 %v1090_v32, %s1965_s17 }
 0x853   : > { %v1047_v33 = vpop.f32.mrf.mxu0 }
 0x854   : > { %v1091_v34 = vmax.f32 %v1047_v33, 0.0 }
 0x856   : > { %1109 = vrot.lane.b32.xlu1 %v1091_v34, %s1965_s17 }
 0x85b   : > { %v1050_v35 = vpop.f32.mrf.mxu0 }
 0x85c   : > { %v1092_v36 = vmax.f32 %v1050_v35, 0.0 }
 0x85e   : > { %1111 = vrot.lane.b32.xlu0 %v1092_v36, %s1965_s17 }
 0x863   : > { %v1053_v37 = vpop.f32.mrf.mxu0 }
 0x864   : > { %v1093_v38 = vmax.f32 %v1053_v37, 0.0 }
 0x866   : > { %1113 = vrot.lane.b32.xlu2 %v1093_v38, %s1965_s17 }
 0x86b   : > { %v1056_v39 = vpop.f32.mrf.mxu0 }
 0x86c   : > { %v1094_v40 = vmax.f32 %v1056_v39, 0.0 }
 0x86e   : > { %1115 = vrot.lane.b32.xlu1 %v1094_v40, %s1965_s17 }
 0x873   : > { %v1059_v41 = vpop.f32.mrf.mxu0 }
 0x874   : > { %v1095_v42 = vmax.f32 %v1059_v41, 0.0 }
 0x876   : > { %1117 = vrot.lane.b32.xlu0 %v1095_v42, %s1965_s17  ;;  %v965_v42 = vld [vmem:[#allocation7 + $0x1a0] sm:$0xff] }
 0x877   : > { %1704 = vmatmul.msk.f32.gmra.mxu0 %vm765_vm11, %v965_v42 }
 0x87b   : > { %v1062_v43 = vpop.f32.mrf.mxu0 }
 0x87c   : > { %v1096_v44 = vmax.f32 %v1062_v43, 0.0 }
 0x87e   : > { %1119 = vrot.lane.b32.xlu2 %v1096_v44, %s1965_s17  ;;  %s1909_s17 = scalar_lea.hbm %s2475_s2, 2 }
 0x87f   : > { %p1911_p8 = scmp.lt.s32.totalorder %s1909_s17, %s1905_s5 }
 0x881   : > { %p1912_p7 = por %p1911_p8, %p1910_p12 }
 0x883   : > { %p1913_p9 = pnand %p1912_p7, %p1908_p5 }
 0x8a8   : > { %v1108_v45 = vpop.permute.xlu2 %1107 }
 0x8a9   : > { %1131 = vst.msk [vmem:[#allocation2 + $0x10] sm:$0xff] %vm200_vm2, %v1108_v45 }
 0x8aa   : > { %1132 = vst.msk [vmem:[#allocation2 + $0x18] sm:$0xff] %vm177_vm0, %v1108_v45 }
 0x8b0   : > { %v2313_v46 = vld [vmem:[#allocation2 + $0x10] sm:$0xff] }
 0x8b1   : > { %1197 = vrot.lane.b32.xlu0 %v2313_v46, %s1967_s7  ;;  %v1164_v53 = vld [vmem:[#allocation2 + $0x18] sm:$0xff] }
 0x8b8   : > { %v1106_v47 = vpop.permute.xlu0 %1105 }
 0x8b9   : > { %1129 = vst.msk [vmem:[#allocation2] sm:$0xff] %vm200_vm2, %v1106_v47 }
 0x8ba   : > { %1130 = vst.msk [vmem:[#allocation2 + $0x8] sm:$0xff] %vm177_vm0, %v1106_v47 }
 0x8c0   : > { %v2319_v48 = vld [vmem:[#allocation2] sm:$0xff]  ;;  %v1114_v49 = vpop.permute.xlu2 %1113 }
 0x8c1   : > { %1193 = vrot.lane.b32.xlu1 %v2319_v48, %s1967_s7  ;;  %v1162_v50 = vld [vmem:[#allocation2 + $0x8] sm:$0xff]  ;;  %1137 = vst.msk [vmem:[#allocation2 + $0x40] sm:$0xff] %vm200_vm2, %v1114_v49 }
 0x8c2   : > { %1195 = vrot.lane.b32.xlu2 %v1162_v50, %s1967_s7  ;;  %1138 = vst.msk [vmem:[#allocation2 + $0x48] sm:$0xff] %vm177_vm0, %v1114_v49  ;;  %v966_v49 = vld [vmem:[#allocation7 + $0x1b0] sm:$0xff] }
 0x8c3   : > { %1705 = vmatmul.msk.f32.gmra.mxu0 %vm765_vm11, %v966_v49 }
 0x8c8   : > { %v2326_v51 = vld [vmem:[#allocation2 + $0x40] sm:$0xff]  ;;  %v1110_v52 = vpop.permute.xlu1 %1109 }
 0x8c9   : > { %1199 = vrot.lane.b32.xlu1 %v1164_v53, %s1967_s7  ;;  %1133 = vst.msk [vmem:[#allocation2 + $0x20] sm:$0xff] %vm200_vm2, %v1110_v52  ;;  %v1258_v62 = vld [vmem:[#allocation2 + $0x48] sm:$0xff] }
 0x8ca   : > { %1134 = vst.msk [vmem:[#allocation2 + $0x28] sm:$0xff] %vm177_vm0, %v1110_v52 }
 0x8d0   : > { %v1112_v54 = vpop.permute.xlu0 %1111  ;;  %v2332_v55 = vld [vmem:[#allocation2 + $0x20] sm:$0xff] }
 0x8d1   : > { %1135 = vst.msk [vmem:[#allocation2 + $0x30] sm:$0xff] %vm200_vm2, %v1112_v54  ;;  %v1166_v56 = vld [vmem:[#allocation2 + $0x28] sm:$0xff]  ;;  %1201 = vrot.lane.b32.xlu2 %v2332_v55, %s1967_s7 }
 0x8d2   : > { %1136 = vst.msk [vmem:[#allocation2 + $0x38] sm:$0xff] %vm177_vm0, %v1112_v54  ;;  %1203 = vrot.lane.b32.xlu0 %v1166_v56, %s1967_s7 }
 0x8d8   : > { %v2338_v57 = vld [vmem:[#allocation2 + $0x30] sm:$0xff]  ;;  %v1120_v58 = vpop.permute.xlu2 %1119 }
 0x8d9   : > { %v1168_v59 = vld [vmem:[#allocation2 + $0x38] sm:$0xff]  ;;  %1143 = vst.msk [vmem:[#allocation2 + $0x70] sm:$0xff] %vm200_vm2, %v1120_v58 }
 0x8da   : > { %1207 = vrot.lane.b32.xlu1 %v1168_v59, %s1967_s7  ;;  %1295 = vrot.lane.b32.xlu2 %v1168_v59, %s1972_s15  ;;  %1144 = vst.msk [vmem:[#allocation2 + $0x78] sm:$0xff] %vm177_vm0, %v1120_v58  ;;  %v967_v58 = vld [vmem:[#allocation7 + $0x1c0] sm:$0xff]  ;;  %v968_v59 = vld [vmem:[#allocation7 + $0x1d0] sm:$0xff] }
 0x8db   : > { %1205 = vrot.lane.b32.xlu0 %v2338_v57, %s1967_s7  ;;  %1156 = vst [vmem:[#allocation3 + $0x48] sm:$0xff] %v2338_v57  ;;  %1706 = vmatmul.msk.f32.gmra.mxu0 %vm765_vm11, %v967_v58 }
 0x8dc   : > { %1707 = vmatmul.msk.f32.vlgmr.msrb.gmra.mxu2 %vm765_vm11, %v968_v59 }
 0x8e0   : > { %v1116_v60 = vpop.permute.xlu1 %1115  ;;  %v2347_v61 = vld [vmem:[#allocation2 + $0x70] sm:$0xff] }
 0x8e1   : > { %1139 = vst.msk [vmem:[#allocation2 + $0x50] sm:$0xff] %vm200_vm2, %v1116_v60  ;;  %v1176_v3 = vld [vmem:[#allocation2 + $0x78] sm:$0xff] }
 0x8e2   : > { %1140 = vst.msk [vmem:[#allocation2 + $0x58] sm:$0xff] %vm177_vm0, %v1116_v60  ;;  %1293 = vrot.lane.b32.xlu1 %v2338_v57, %s1972_s15  ;;  %1211 = vrot.lane.b32.xlu2 %v1258_v62, %s1967_s7 }
 0x8e3   : > { %1299 = vrot.lane.b32.xlu0 %v1258_v62, %s1972_s15 }
 0x8e8   : > { %v2355_v63 = vld [vmem:[#allocation2 + $0x50] sm:$0xff]  ;;  %v1118_v0 = vpop.permute.xlu0 %1117 }
 0x8e9   : > { %v1172_v1 = vld [vmem:[#allocation2 + $0x58] sm:$0xff]  ;;  %1141 = vst.msk [vmem:[#allocation2 + $0x60] sm:$0xff] %vm200_vm2, %v1118_v0 }
 0x8ea   : > { %1209 = vrot.lane.b32.xlu1 %v2326_v51, %s1967_s7  ;;  %1297 = vrot.lane.b32.xlu2 %v2326_v51, %s1972_s15  ;;  %1142 = vst.msk [vmem:[#allocation2 + $0x68] sm:$0xff] %vm177_vm0, %v1118_v0  ;;  %v1364_v0 = vld [vmem:[#allocation7 + $0x228] sm:$0xff] }
 0x8eb   : > { %1215 = vrot.lane.b32.xlu0 %v1172_v1, %s1967_s7 }
 0x8f0   : > { %v2364_v5 = vld [vmem:[#allocation2 + $0x60] sm:$0xff] }
 0x8f1   : > { %1159 = vst [vmem:[#allocation3 + $0x40] sm:$0xff] %v2364_v5  ;;  %v1174_v2 = vld [vmem:[#allocation2 + $0x68] sm:$0xff] }
 0x8f2   : > { %1303 = vrot.lane.b32.xlu1 %v1172_v1, %s1972_s15  ;;  %1213 = vrot.lane.b32.xlu2 %v2355_v63, %s1967_s7  ;;  %v969_v1 = vld [vmem:[#allocation7 + $0x1e0] sm:$0xff] }
 0x8f3   : > { %1301 = vrot.lane.b32.xlu0 %v2355_v63, %s1972_s15  ;;  %1708 = vmatmul.msk.f32.gmra.mxu2 %vm765_vm11, %v969_v1 }
 0x8fa   : > { %1219 = vrot.lane.b32.xlu1 %v1174_v2, %s1967_s7  ;;  %1305 = vrot.lane.b32.xlu2 %v2364_v5, %s1972_s15 }
 0x8fb   : > { %1217 = vrot.lane.b32.xlu0 %v2364_v5, %s1967_s7 }
 0x902   : > { %1223 = vrot.lane.b32.xlu2 %v1176_v3, %s1967_s7  ;;  %1221 = vrot.lane.b32.xlu1 %v2347_v61, %s1967_s7 }
 0x903   : > { %1307 = vrot.lane.b32.xlu0 %v1174_v2, %s1972_s15  ;;  %v1368_v2 = vld [vmem:[#allocation7 + $0x248] sm:$0xff] }
 0x90a   : > { %1311 = vrot.lane.b32.xlu2 %v1176_v3, %s1972_s15  ;;  %1309 = vrot.lane.b32.xlu1 %v2347_v61, %s1972_s15  ;;  %v1367_v3 = vld [vmem:[#allocation7 + $0x240] sm:$0xff] }
 0x90b   : > { %1289 = vrot.lane.b32.xlu0 %v2332_v55, %s1972_s15 }
 0x912   : > { %1285 = vrot.lane.b32.xlu2 %v2313_v46, %s1972_s15  ;;  %1291 = vrot.lane.b32.xlu1 %v1166_v56, %s1972_s15 }
 0x913   : > { %1287 = vrot.lane.b32.xlu0 %v1164_v53, %s1972_s15 }
 0x91a   : > { %1283 = vrot.lane.b32.xlu2 %v1162_v50, %s1972_s15  ;;  %1281 = vrot.lane.b32.xlu1 %v2319_v48, %s1972_s15 }
 0x91c   : > { %v1196_v4 = vpop.permute.xlu2 %1195 }
 0x923   : > { %v1198_v9 = vpop.permute.xlu0 %1197 }
 0x92b   : > { %v1202_v6 = vpop.permute.xlu2 %1201 }
 0x933   : > { %v1194_v7 = vpop.permute.xlu1 %1193 }
 0x934   : > { %v1225_v8 = vsel %vm223_vm5, %v1194_v7, %v1196_v4  ;;  %v1296_v11 = vpop.permute.xlu2 %1295  ;;  %v1369_v4 = vld [vmem:[#allocation7 + $0x250] sm:$0xff]  ;;  %v1371_v7 = vld [vmem:[#allocation7 + $0x260] sm:$0xff] }
 0x93b   : > { %v1200_v10 = vpop.permute.xlu1 %1199 }
 0x93c   : > { %v1226_v12 = vsel %vm223_vm5, %v1198_v9, %v1200_v10  ;;  %v1212_v14 = vpop.permute.xlu2 %1211  ;;  %v1373_v9 = vld [vmem:[#allocation7 + $0x270] sm:$0xff]  ;;  %v1376_v10 = vld [vmem:[#allocation7 + $0x288] sm:$0xff] }
 0x944   : > { %v1204_v13 = vpop.permute.xlu0 %1203  ;;  %v1298_v19 = vpop.permute.xlu2 %1297 }
 0x945   : > { %v1227_v15 = vsel %vm223_vm5, %v1202_v6, %v1204_v13  ;;  %v1372_v6 = vld [vmem:[#allocation7 + $0x268] sm:$0xff]  ;;  %v1377_v13 = vld [vmem:[#allocation7 + $0x290] sm:$0xff] }
 0x94c   : > { %v1208_v16 = vpop.permute.xlu1 %1207  ;;  %v1214_v24 = vpop.permute.xlu2 %1213 }
 0x94d   : > { %v1206_v17 = vpop.permute.xlu0 %1205 }
 0x94e   : > { %v1228_v18 = vsel %vm223_vm5, %v1206_v17, %v1208_v16  ;;  %v1065_v17 = vpop.f32.mrf.mxu0 }
 0x954   : > { %v1294_v20 = vpop.permute.xlu1 %1293  ;;  %v1306_v30 = vpop.permute.xlu2 %1305 }
 0x955   : > { %v1316_v21 = vsel %vm930_vm12, %v1294_v20, %v1296_v11  ;;  %v1300_v22 = vpop.permute.xlu0 %1299  ;;  %v1375_v11 = vld [vmem:[#allocation7 + $0x280] sm:$0xff] }
 0x956   : > { %v1317_v23 = vsel %vm930_vm12, %v1298_v19, %v1300_v22  ;;  %v1068_v20 = vpop.f32.mrf.mxu0 }
 0x95c   : > { %v1210_v25 = vpop.permute.xlu1 %1209  ;;  %v1224_v36 = vpop.permute.xlu2 %1223 }
 0x95d   : > { %v1229_v27 = vsel %vm223_vm5, %v1210_v25, %v1212_v14  ;;  %v1216_v28 = vpop.permute.xlu0 %1215 }
 0x95e   : > { %1245 = vst [vmem:[#allocation3 + $0x18] sm:$0xff] %v1229_v27  ;;  %v1230_v29 = vsel %vm223_vm5, %v1214_v24, %v1216_v28  ;;  %v1071_v26 = vpop.f32.mrf.mxu0 }
 0x964   : > { %v1304_v31 = vpop.permute.xlu1 %1303  ;;  %v1312_v43 = vpop.permute.xlu2 %1311 }
 0x965   : > { %v1302_v32 = vpop.permute.xlu0 %1301 }
 0x966   : > { %v1318_v33 = vsel %vm930_vm12, %v1302_v32, %v1304_v31 }
 0x96c   : > { %v1220_v34 = vpop.permute.xlu1 %1219  ;;  %v1286_v50 = vpop.permute.xlu2 %1285 }
 0x96d   : > { %v1218_v35 = vpop.permute.xlu0 %1217 }
 0x96e   : > { %v1231_v37 = vsel %vm223_vm5, %v1218_v35, %v1220_v34 }
 0x974   : > { %v1222_v38 = vpop.permute.xlu1 %1221  ;;  %v1284_v60 = vpop.permute.xlu2 %1283 }
 0x975   : > { %v1308_v39 = vpop.permute.xlu0 %1307  ;;  %v1232_v40 = vsel %vm223_vm5, %v1222_v38, %v1224_v36 }
 0x976   : > { %v1319_v41 = vsel %vm930_vm12, %v1306_v30, %v1308_v39  ;;  %1407 = vmatpush.msrb.mxu1 %v1232_v40 }
 0x978   : > { %1408 = vmatpush.msrb.mxu1 %v1231_v37 }
 0x97a   : > { %1409 = vmatpush.msrb.mxu1 %v1230_v29 }
 0x97c   : > { %v1310_v44 = vpop.permute.xlu1 %1309  ;;  %1410 = vmatpush.msrb.mxu1 %v1229_v27 }
 0x97d   : > { %v1290_v45 = vpop.permute.xlu0 %1289  ;;  %v1320_v47 = vsel %vm930_vm12, %v1310_v44, %v1312_v43 }
 0x97e   : > { %1411 = vmatpush.msrb.mxu1 %v1228_v18  ;;  %1456 = vmatpush.msrb.mxu3 %v1320_v47 }
 0x980   : > { %1412 = vmatpush.msrb.mxu1 %v1227_v15  ;;  %1457 = vmatpush.msrb.mxu3 %v1319_v41 }
 0x982   : > { %1413 = vmatpush.msrb.mxu1 %v1226_v12  ;;  %1458 = vmatpush.msrb.mxu3 %v1318_v33  ;;  %v1378_v12 = vld [vmem:[#allocation7 + $0x298] sm:$0xff] }
 0x984   : > { %v1292_v52 = vpop.permute.xlu1 %1291  ;;  %1414 = vmatpush.msrb.mxu1 %v1225_v8  ;;  %1459 = vmatpush.msrb.mxu3 %v1317_v23  ;;  %v1374_v8 = vld [vmem:[#allocation7 + $0x278] sm:$0xff]  ;;  %v1074_v23 = vpop.f32.mrf.mxu2 }
 0x985   : > { %v1288_v53 = vpop.permute.xlu0 %1287  ;;  %v1315_v54 = vsel %vm930_vm12, %v1290_v45, %v1292_v52 }
 0x986   : > { %v1314_v56 = vsel %vm930_vm12, %v1286_v50, %v1288_v53  ;;  %1415 = vmatpush.msrb.mxu1 %v2347_v61  ;;  %1460 = vmatpush.msrb.mxu3 %v1316_v21 }
 0x988   : > { %1416 = vmatpush.msrb.mxu1 %v2364_v5  ;;  %1461 = vmatpush.msrb.mxu3 %v1315_v54  ;;  %v970_v5 = vld [vmem:[#allocation7 + $0x1f0] sm:$0xff] }
 0x989   : > { %1709 = vmatmul.msk.f32.gmra.mxu2 %vm765_vm11, %v970_v5 }
 0x98a   : > { %1417 = vmatpush.msrb.mxu1 %v2355_v63  ;;  %1462 = vmatpush.msrb.mxu3 %v1314_v56  ;;  %v1363_v63 = vld [vmem:[#allocation7 + $0x220] sm:$0xff] }
 0x98c   : > { %v1282_v62 = vpop.permute.xlu1 %1281  ;;  %1418 = vmatpush.msrb.mxu1 %v2326_v51  ;;  %v1366_v51 = vld [vmem:[#allocation7 + $0x238] sm:$0xff]  ;;  %v1077_v32 = vpop.f32.mrf.mxu2 }
 0x98d   : > { %v1313_v61 = vsel %vm930_vm12, %v1282_v62, %v1284_v60 }
 0x98e   : > { %1419 = vmatpush.msrb.mxu1 %v2338_v57  ;;  %1463 = vmatpush.msrb.mxu3 %v1313_v61  ;;  %v1365_v57 = vld [vmem:[#allocation7 + $0x230] sm:$0xff] }
 0x98f   : > { %1713 = vmatmul.msk.f32.vlgmr.msrb.gmra.mxu3 %vm1379_vm13, %v1364_v0 }
 0x990   : > { %1420 = vmatpush.msrb.mxu1 %v2332_v55  ;;  %v971_v55 = vld [vmem:[#allocation7 + $0x200] sm:$0xff] }
 0x991   : > { %1710 = vmatmul.msk.f32.gmra.mxu2 %vm765_vm11, %v971_v55 }
 0x992   : > { %1421 = vmatpush.msrb.mxu1 %v2313_v46  ;;  %v1370_v46 = vld [vmem:[#allocation7 + $0x258] sm:$0xff] }
 0x994   : > { %1422 = vmatpush.msrb.mxu1 %v2319_v48  ;;  %v972_v48 = vld [vmem:[#allocation7 + $0x210] sm:$0xff] }
 0x995   : > { %1423 = vmatmul.f32.vlgmr.msrb.gmra.mxu1 %v1363_v63 }
 0x997   : > { %1714 = vmatmul.msk.f32.gmra.mxu3 %vm1379_vm13, %v1366_v51 }
 0x999   : > { %1711 = vmatmul.msk.f32.gmra.mxu2 %vm765_vm11, %v972_v48 }
 0x99d   : > { %1426 = vmatmul.f32.gmra.mxu1 %v1365_v57 }
 0x99f   : > { %1715 = vmatmul.msk.f32.gmra.mxu3 %vm1379_vm13, %v1368_v2 }
 0x9a5   : > { %1429 = vmatmul.f32.gmra.mxu1 %v1367_v3 }
 0x9a7   : > { %1716 = vmatmul.msk.f32.gmra.mxu3 %vm1379_vm13, %v1370_v46 }
 0x9ad   : > { %1432 = vmatmul.f32.gmra.mxu1 %v1369_v4 }
 0x9af   : > { %1717 = vmatmul.msk.f32.gmra.mxu3 %vm1379_vm13, %v1372_v6 }
 0x9b5   : > { %1435 = vmatmul.f32.gmra.mxu1 %v1371_v7 }
 0x9b7   : > { %1718 = vmatmul.msk.f32.gmra.mxu3 %vm1379_vm13, %v1374_v8 }
 0x9bd   : > { %1438 = vmatmul.f32.gmra.mxu1 %v1373_v9 }
 0x9bf   : > { %1719 = vmatmul.msk.f32.gmra.mxu3 %vm1379_vm13, %v1376_v10  ;;  %v1513_v10 = vld [vmem:[#allocation7 + $0x2a0] ss:$0 sm:$0xff] }
 0x9c5   : > { %1441 = vmatmul.f32.gmra.mxu1 %v1375_v11  ;;  %v1974_v11 = vmov 64  }
 0x9c6   : > { %1827 = vset.pattern.permute.xlu1 %v1974_v11  ;;  %1828 = vset.pattern.permute.xlu0 %v1974_v11 }
 0x9c7   : > { %1720 = vmatmul.msk.f32.gmra.mxu3 %vm1379_vm13, %v1378_v12 }
 0x9cd   : > { %1444 = vmatmul.f32.gmra.mxu1 %v1377_v13 }
 0xa0c   : > { %v1080_v40 = vpop.f32.mrf.mxu2 }
 0xa12   : > { %v1424_v14 = vpop.f32.mrf.mxu1  ;;  %v1465_v15 = vpop.f32.mrf.mxu3 }
 0xa13   : > { %v1466_v16 = vadd.f32 %v1465_v15, %v1424_v14 }
 0xa14   : > { %v1083_v53 = vpop.f32.mrf.mxu2 }
 0xa15   : > { %v1489_v55 = vmax.f32 %v1466_v16, 0.0 }
 0xa17   : > { %v1497_v6 = vadd.f32 %v1489_v55, %v1065_v17 }
 0xa19   : > { %v1505_v8 = vmax.f32 %v1497_v6, 0.0 }
 0xa1a   : > { %v1427_v18 = vpop.f32.mrf.mxu1  ;;  %v1468_v19 = vpop.f32.mrf.mxu3 }
 0xa1b   : > { %v1469_v61 = vadd.f32 %v1468_v19, %v1427_v18 }
 0xa1c   : > { %v1086_v63 = vpop.f32.mrf.mxu2 }
 0xa1d   : > { %v1490_v57 = vmax.f32 %v1469_v61, 0.0 }
 0xa1f   : > { %v1498_v48 = vadd.f32 %v1490_v57, %v1068_v20 }
 0xa21   : > { %v1506_v7 = vmax.f32 %v1498_v48, 0.0 }
 0xa22   : > { %v1430_v21 = vpop.f32.mrf.mxu1  ;;  %v1471_v22 = vpop.f32.mrf.mxu3 }
 0xa23   : > { %v1472_v24 = vadd.f32 %v1471_v22, %v1430_v21  ;;  %v1822_v9 = vpack.i.bf16 %v1505_v8, %v1506_v7 }
 0xa25   : > { %v1491_v25 = vmax.f32 %v1472_v24, 0.0 }
 0xa27   : > { %v1499_v30 = vadd.f32 %v1491_v25, %v1071_v26 }
 0xa29   : > { %v1507_v34 = vmax.f32 %v1499_v30, 0.0 }
 0xa2a   : > { %v1433_v27 = vpop.f32.mrf.mxu1  ;;  %v1474_v28 = vpop.f32.mrf.mxu3 }
 0xa2b   : > { %v1475_v29 = vadd.f32 %v1474_v28, %v1433_v27 }
 0xa2d   : > { %v1492_v31 = vmax.f32 %v1475_v29, 0.0 }
 0xa2f   : > { %v1500_v33 = vadd.f32 %v1492_v31, %v1074_v23 }
 0xa31   : > { %v1508_v35 = vmax.f32 %v1500_v33, 0.0 }
 0xa32   : > { %v1436_v36 = vpop.f32.mrf.mxu1  ;;  %v1477_v37 = vpop.f32.mrf.mxu3 }
 0xa33   : > { %v1817_v38 = vpack.i.bf16 %v1507_v34, %v1508_v35  ;;  %v1478_v39 = vadd.f32 %v1477_v37, %v1436_v36 }
 0xa35   : > { %1818 = vrot.lane.b32.xlu2 %v1817_v38, %s1973_s18  ;;  %v1493_v41 = vmax.f32 %v1478_v39, 0.0 }
 0xa37   : > { %v1501_v45 = vadd.f32 %v1493_v41, %v1077_v32 }
 0xa39   : > { %v1509_v50 = vmax.f32 %v1501_v45, 0.0 }
 0xa3a   : > { %v1439_v42 = vpop.f32.mrf.mxu1  ;;  %v1480_v43 = vpop.f32.mrf.mxu3 }
 0xa3b   : > { %v1481_v44 = vadd.f32 %v1480_v43, %v1439_v42 }
 0xa3d   : > { %v1494_v47 = vmax.f32 %v1481_v44, 0.0 }
 0xa3f   : > { %v1502_v49 = vadd.f32 %v1494_v47, %v1080_v40 }
 0xa41   : > { %v1510_v52 = vmax.f32 %v1502_v49, 0.0 }
 0xa42   : > { %v1442_v54 = vpop.f32.mrf.mxu1  ;;  %v1483_v56 = vpop.f32.mrf.mxu3 }
 0xa43   : > { %v1812_v58 = vpack.i.bf16 %v1509_v50, %v1510_v52  ;;  %v1484_v59 = vadd.f32 %v1483_v56, %v1442_v54 }
 0xa45   : > { %1813 = vrot.lane.b32.xlu1 %v1812_v58, %s1973_s18  ;;  %v1495_v60 = vmax.f32 %v1484_v59, 0.0 }
 0xa47   : > { %v1503_v51 = vadd.f32 %v1495_v60, %v1083_v53 }
 0xa49   : > { %v1511_v3 = vmax.f32 %v1503_v51, 0.0 }
 0xa4a   : > { %v1445_v62 = vpop.f32.mrf.mxu1  ;;  %v1486_v0 = vpop.f32.mrf.mxu3 }
 0xa4b   : > { %v1487_v1 = vadd.f32 %v1486_v0, %v1445_v62 }
 0xa4d   : > { %v1496_v5 = vmax.f32 %v1487_v1, 0.0  ;;  %1516 = vperm.xlu1 %1827, %v1513_v10  }
 0xa4f   : > { %v1504_v2 = vadd.f32 %v1496_v5, %v1086_v63 }
 0xa51   : > { %v1512_v46 = vmax.f32 %v1504_v2, 0.0 }
 0xa53   : > { %v1807_v4 = vpack.i.bf16 %v1511_v3, %v1512_v46 }
 0xa55   : > { %1808 = vrot.lane.b32.xlu0 %v1807_v4, %s1973_s18 }
 0xa5d   : > { %1823 = vrot.lane.b32.xlu0 %v1822_v9, %s1973_s18 }
 0xa8f   : > { %v1819_v17 = vpop.permute.xlu2 %1818 }
 0xa90   : > { %v1820_v19 = vunpack.i.l.bf16 %v1819_v17  ;;  %v1821_v21 = vunpack.i.h.bf16 %v1819_v17 }
 0xab7   : > { %v1814_v14 = vpop.permute.xlu1 %1813 }
 0xab8   : > { %v1815_v16 = vunpack.i.l.bf16 %v1814_v14  ;;  %v1816_v18 = vunpack.i.h.bf16 %v1814_v14 }
 0xabf   : > { %v1517_v24 = vpop.permute.xlu1 %1516 }
 0xac7   : > { %v1809_v12 = vpop.permute.xlu0 %1808 }
 0xac8   : > { %v1810_v13 = vunpack.i.l.bf16 %v1809_v12  ;;  %v1811_v15 = vunpack.i.h.bf16 %v1809_v12 }
 0xaca   : > { %1561 = vmatpush.msra.mxu2 %v1810_v13 }
 0xacc   : > { %1562 = vmatpush.msra.mxu2 %v1811_v15 }
 0xace   : > { %1563 = vmatpush.msra.mxu2 %v1815_v16 }
 0xacf   : > { %v1824_v20 = vpop.permute.xlu0 %1823 }
 0xad0   : > { %1564 = vmatpush.msra.mxu2 %v1816_v18  ;;  %v1825_v22 = vunpack.i.l.bf16 %v1824_v20  ;;  %v1826_v23 = vunpack.i.h.bf16 %v1824_v20 }
 0xad2   : > { %1565 = vmatpush.msra.mxu2 %v1820_v19 }
 0xad4   : > { %1566 = vmatpush.msra.mxu2 %v1821_v21 }
 0xad6   : > { %1567 = vmatpush.msra.mxu2 %v1825_v22 }
 0xad8   : > { %1568 = vmatpush.msra.mxu2 %v1826_v23 }
 0xad9   : > { %1721 = vmatmul.msk.f32.vlgmr.msra.gmra.mxu2 %vm930_vm12, %v1513_v10 }
 0xb5c   : > { %v1570_v25 = vpop.f32.mrf.mxu2 }
 0xb5d   : > { %v1571_v26 = vadd.f32 %v1570_v25, %v1517_v24 }
 0xb5f   : > { %1574 = vst.msk [vmem:[%s176_s22] sm:$0x1] %vm1573_vm14, %v1571_v26 }
 0xb60   : > { %1916 = shalt.err (!%p1913_p9)
}
 0xb61   : > { %1743 = dma.vmem_to_hbm [thread:$0]  (%p2050_p13), %s1587_s24, 16, %s1589_s25, %s1576_s3  }
 0xb62 PF: > { %s1600_s29 = sand.u32 1, %s1947_s9   ;;  %p2481_p10 = scmp.ge.s32.totalorder %s1959_s12, 2 }
 0xb63   : > { %s1601_s8 = scalar_lea.sflag [#allocation6], %s1600_s29 }
 0xb64   : > { %p1754_p11 = pnand %p2481_p10, %p2055_p4 }
 0xb66   : > { %p1755_p0 = pneg %p1754_p11 }
 0xb68   : > { %1942 = dma.done.wait (%p1755_p0), %s1601_s8, 16  }
 0xb69   : > { %1944 = vsyncadd (%p1755_p0), %s1601_s8, 4294967280  ;;  %p16_p2 = scmp.ge.s32.totalorder %s2030_s23, 4   ;;  %s2482_s9 = smov %s1951_s10 }
 0xb6a   : > { %s2483_s10 = smov %s1955_s11  ;;  %s2484_s11 = smov %s2042_s26 }
 0xb6b   : > { %s2485_s12 = smov %s2030_s23  ;;  %18 = sbr.rel (!%p16_p2) target bundleno = 6 (0x6), region = 77 }
 0xb70   :  { %1606 = vsyncpa [#allocation5], 1 }
 0xb71   :  { %1608 = vsyncpa [#allocation5 + $0x1], 1 }
 0xb72   :  { %1609 = vsyncpa [#allocation8], 1 }
 0xb73   :  { %1610 = vsyncpa [#allocation6], 1 }
 0xb74   :  { %1612 = vsyncpa [#allocation6 + $0x1], 1 }

</bundles_post_ra>
